<compile_context>
chip_gen: v6e
topology: v6e:2x2x1
jax: 0.10.0
libtpu: 0.0.40
codegen_flags: <defaults>
</compile_context>

<pallas_src>
import functools

import jax
import jax.numpy as jnp
from jax import lax
from jax.experimental import pallas as pl
from jax.experimental.pallas import tpu as pltpu

K = 5  # Conv1d kernel size


# ------------------------------ Kernel helpers -------------------------------

def _shift_lanes(y, off):
    """z[:, t] = y[:, t + off], zero-filled outside [0, L).  `off` is static."""
    c, length = y.shape
    if off == 0:
        return y
    if abs(off) >= length:
        return jnp.zeros_like(y)
    zeros = jnp.zeros((c, abs(off)), y.dtype)
    if off > 0:
        return jnp.concatenate([y[:, off:], zeros], axis=-1)
    return jnp.concatenate([zeros, y[:, :off]], axis=-1)


def _conv_same(y, w_ref, b_ref, d):
    """Dilated 'same' Conv1d in (C, L) layout: K accumulating MXU matmuls.

    y     : (C_in, L) f32
    w_ref : (K, C_out, C_in)   per-tap weight matrices
    b_ref : (C_out, 1)
    """
    length = y.shape[-1]
    c_out = w_ref.shape[1]
    acc = jnp.zeros((c_out, length), jnp.float32)
    for k in range(K):
        off = (k - (K - 1) // 2) * d          # offsets -2d..+2d  ('same' pad)
        tap = _shift_lanes(y, off)            # (C_in, L), zero outside bounds
        acc = acc + jnp.dot(w_ref[k], tap, preferred_element_type=jnp.float32)
    return acc + b_ref[...]                   # (C_out, 1) broadcasts over lanes


# ------------------------------ Fused kernel ---------------------------------

def fused_feature_kernel(x_ref, w1_ref, b1_ref, w2_ref, b2_ref, w3_ref, b3_ref,
                         w4_ref, b4_ref, o_ref, *, d):
    # x_ref : (B_TILE, C_in, L)      NCL block, one batch tile
    # wN_ref: (K, C_out, C_in)       per-tap weights
    # bN_ref: (C_out, 1)
    # o_ref : (B_TILE, C_conv, L2)
    L = x_ref.shape[-1]
    L2 = o_ref.shape[-1]

    # One-hot (L, L2) even-lane selector: the stride-2 downsample of
    # MaxPool1d(2) expressed as a single MXU matmul, so the pooled result is
    # produced lane-dense with no strided loads / minor-dim reshapes.
    rows = lax.broadcasted_iota(jnp.int32, (L, L2), 0)
    cols = lax.broadcasted_iota(jnp.int32, (L, L2), 1)
    sel_even = (rows == 2 * cols).astype(jnp.float32)

    for b in range(x_ref.shape[0]):           # static batch-tile unroll
        x = x_ref[b].astype(jnp.float32)      # (C_in, L)

        # ---- conv1 ----
        y = _conv_same(x, w1_ref, b1_ref, d)  # (C_conv, L) f32

        # ---- MaxPool1d(2) then ReLU (matches PyTorch order) ----
        m = jnp.maximum(y, _shift_lanes(y, 1))                 # pairwise max
        y = jnp.dot(m, sel_even, preferred_element_type=jnp.float32)  # (C, L2)
        y = jnp.maximum(y, 0.0)
        # TODO(synk): Dropout1d(0.5) treated as identity (eval-mode inference);
        # training-mode channel dropout (RNG) is not implemented.

        # ---- triconv: 3 x (dilated conv -> ReLU); stays in vregs ----
        for w_ref, b_ref in ((w2_ref, b2_ref), (w3_ref, b3_ref),
                             (w4_ref, b4_ref)):
            y = jnp.maximum(_conv_same(y, w_ref, b_ref, d), 0.0)

        o_ref[b] = y.astype(o_ref.dtype)


# -------------------------------- Wrapper -------------------------------------

def feature_extraction(x_ncl, params, dilation, b_tile=1):
    """Pallas implementation of FeatureExtraction.forward (eval mode).

    x_ncl: (N, C_in, L) in PyTorch NCL layout -> returns (N, C_conv, L // 2).
    """
    N, c_in, L = x_ncl.shape
    c_conv = params["conv1_w"].shape[0]
    L2 = L // 2
    assert N % b_tile == 0, "b_tile must divide the batch"

    def prep_w(w):  # PyTorch (C_out, C_in, K) -> (K, C_out, C_in)
        return jnp.transpose(w, (2, 0, 1))

    def prep_b(b):  # (C_out,) -> (C_out, 1) (broadcasts over lanes in-kernel)
        return b.reshape(-1, 1)

    w1, b1 = prep_w(params["conv1_w"]), prep_b(params["conv1_b"])
    tw = [prep_w(w) for (w, _) in params["triconv"]]
    tb = [prep_b(b) for (_, b) in params["triconv"]]

    wspec1 = pl.BlockSpec((K, c_conv, c_in), lambda n: (0, 0, 0))
    wspec = pl.BlockSpec((K, c_conv, c_conv), lambda n: (0, 0, 0))
    bspec = pl.BlockSpec((c_conv, 1), lambda n: (0, 0))

    out = pl.pallas_call(
        functools.partial(fused_feature_kernel, d=dilation),
        out_shape=jax.ShapeDtypeStruct((N, c_conv, L2), x_ncl.dtype),
        grid_spec=pltpu.PrefetchScalarGridSpec(
            num_scalar_prefetch=0,
            grid=(N // b_tile,),
            in_specs=[
                pl.BlockSpec((b_tile, c_in, L), lambda n: (n, 0, 0)),
                wspec1, bspec, wspec, bspec, wspec, bspec, wspec, bspec,
            ],
            out_specs=pl.BlockSpec((b_tile, c_conv, L2), lambda n: (n, 0, 0)),
        ),
        compiler_params=pltpu.CompilerParams(
            dimension_semantics=("parallel",)),
    )(x_ncl, w1, b1, tw[0], tb[0], tw[1], tb[1], tw[2], tb[2])

    return out  # already NCL: (N, C_conv, L // 2)


# --------------------------- Pure-JAX reference -------------------------------

def _ref_conv_same(y_ncl, w_oik, b, d):
    pad = d * (K - 1) // 2
    out = lax.conv_general_dilated(
        y_ncl, w_oik, window_strides=(1,), padding=[(pad, pad)],
        rhs_dilation=(d,), dimension_numbers=("NCH", "OIH", "NCH"))
    return out + b[None, :, None]


def ref_forward(x_ncl, params, d):
    y = _ref_conv_same(x_ncl, params["conv1_w"], params["conv1_b"], d)
    N, C, L = y.shape
    L2 = L // 2
    y = jnp.max(y[:, :, :2 * L2].reshape(N, C, L2, 2), axis=-1)  # MaxPool1d(2)
    y = jnp.maximum(y, 0.0)                                      # ReLU
    for w, b in params["triconv"]:
        y = jnp.maximum(_ref_conv_same(y, w, b, d), 0.0)
    return y


# ---------------------------------- Main --------------------------------------

def init_params(key, c_in, c_conv):
    keys = jax.random.split(key, 8)
    s = 0.1
    params = {
        "conv1_w": s * jax.random.normal(keys[0], (c_conv, c_in, K),
                                         jnp.float32),
        "conv1_b": s * jax.random.normal(keys[1], (c_conv,), jnp.float32),
        "triconv": [],
    }
    for i in range(3):
        w = s * jax.random.normal(keys[2 + 2 * i], (c_conv, c_conv, K),
                                  jnp.float32)
        b = s * jax.random.normal(keys[3 + 2 * i], (c_conv,), jnp.float32)
        params["triconv"].append((w, b))
    return params


if __name__ == "__main__":
    N, C_IN, C_CONV, L, DILATION = 2, 4, 32, 16, 2

    key = jax.random.PRNGKey(0)
    k_x, k_p = jax.random.split(key)
    x = jax.random.normal(k_x, (N, C_IN, L), jnp.float32)  # NCL like PyTorch
    params = init_params(k_p, C_IN, C_CONV)

    out = feature_extraction(x, params, DILATION)
    out = jax.block_until_ready(out)

    ref = jax.block_until_ready(ref_forward(x, params, DILATION))
    assert out.shape == (N, C_CONV, L // 2), out.shape
    assert jnp.allclose(out, ref, rtol=1e-4, atol=1e-4), (
        float(jnp.max(jnp.abs(out - ref))))

    print("KERNEL_OK")
</pallas_src>

<mosaic_0001>
module attributes {stable_mosaic.version = 11 : i64} {
  func.func @fused_feature_kernel(%arg0: i32, %arg1: memref<1x4x16xf32, #tpu.memory_space<vmem>>, %arg2: memref<5x32x4xf32, #tpu.memory_space<vmem>>, %arg3: memref<32x1xf32, #tpu.memory_space<vmem>>, %arg4: memref<5x32x32xf32, #tpu.memory_space<vmem>>, %arg5: memref<32x1xf32, #tpu.memory_space<vmem>>, %arg6: memref<5x32x32xf32, #tpu.memory_space<vmem>>, %arg7: memref<32x1xf32, #tpu.memory_space<vmem>>, %arg8: memref<5x32x32xf32, #tpu.memory_space<vmem>>, %arg9: memref<32x1xf32, #tpu.memory_space<vmem>>, %arg10: memref<1x32x8xf32, #tpu.memory_space<vmem>>) attributes {dimension_semantics = [#tpu.dimension_semantics<parallel>], iteration_bounds = array<i64: 2>, scalar_prefetch = 0 : i64, scratch_operands = 0 : i64, tpu.core_type = #tpu.core_type<tc>, window_params = [{transform_indices = @transform_0, window_bounds = array<i64: 1, 4, 16>}, {pipeline_mode = #tpu.pipeline_mode<synchronous>, transform_indices = @transform_1, window_bounds = array<i64: 5, 32, 4>}, {pipeline_mode = #tpu.pipeline_mode<synchronous>, transform_indices = @transform_2, window_bounds = array<i64: 32, 1>}, {pipeline_mode = #tpu.pipeline_mode<synchronous>, transform_indices = @transform_3, window_bounds = array<i64: 5, 32, 32>}, {pipeline_mode = #tpu.pipeline_mode<synchronous>, transform_indices = @transform_4, window_bounds = array<i64: 32, 1>}, {pipeline_mode = #tpu.pipeline_mode<synchronous>, transform_indices = @transform_5, window_bounds = array<i64: 5, 32, 32>}, {pipeline_mode = #tpu.pipeline_mode<synchronous>, transform_indices = @transform_6, window_bounds = array<i64: 32, 1>}, {pipeline_mode = #tpu.pipeline_mode<synchronous>, transform_indices = @transform_7, window_bounds = array<i64: 5, 32, 32>}, {pipeline_mode = #tpu.pipeline_mode<synchronous>, transform_indices = @transform_8, window_bounds = array<i64: 32, 1>}, {transform_indices = @transform_9, window_bounds = array<i64: 1, 32, 8>}]} {
    %0 = tpu.iota {dimensions = array<i32: 0>} : vector<16x8xi32>
    %1 = tpu.iota {dimensions = array<i32: 1>} : vector<16x8xi32>
    %c2_i32 = arith.constant 2 : i32
    %2 = vector.broadcast %c2_i32 : i32 to vector<16x8xi32>
    %3 = arith.muli %2, %1 : vector<16x8xi32>
    %4 = arith.cmpi eq, %0, %3 : vector<16x8xi32>
    %5 = arith.extui %4 : vector<16x8xi1> to vector<16x8xi32>
    %6 = arith.sitofp %5 : vector<16x8xi32> to vector<16x8xf32>
    %c0 = arith.constant 0 : index
    %c0_0 = arith.constant 0 : index
    %c0_1 = arith.constant 0 : index
    %7 = vector.load %arg1[%c0, %c0_0, %c0_1] : memref<1x4x16xf32, #tpu.memory_space<vmem>>, vector<1x4x16xf32>
    %8 = vector.shape_cast %7 : vector<1x4x16xf32> to vector<4x16xf32>
    %cst = arith.constant 0.000000e+00 : f32
    %9 = vector.broadcast %cst : f32 to vector<32x16xf32>
    %cst_2 = arith.constant 0.000000e+00 : f32
    %10 = vector.broadcast %cst_2 : f32 to vector<4x4xf32>
    %11 = vector.extract_strided_slice %8 {offsets = [0, 0], sizes = [4, 12], strides = [1, 1]} : vector<4x16xf32> to vector<4x12xf32>
    %12 = tpu.concatenate %10, %11 in 1 : vector<4x4xf32>, vector<4x12xf32> -> vector<4x16xf32>
    %c0_3 = arith.constant 0 : index
    %c0_4 = arith.constant 0 : index
    %c0_5 = arith.constant 0 : index
    %13 = vector.load %arg2[%c0_3, %c0_4, %c0_5] : memref<5x32x4xf32, #tpu.memory_space<vmem>>, vector<1x32x4xf32>
    %14 = vector.shape_cast %13 : vector<1x32x4xf32> to vector<32x4xf32>
    %cst_6 = arith.constant dense<0.000000e+00> : vector<32x16xf32>
    %15 = tpu.matmul %14, %12, %cst_6 {dimension_numbers = #tpu.dot_dimension_numbers<[1], [0], [0], [1], [0, 0, 1, 1], [], []>} : vector<32x4xf32>, vector<4x16xf32>, vector<32x16xf32> -> vector<32x16xf32>
    %16 = arith.addf %9, %15 : vector<32x16xf32>
    %cst_7 = arith.constant 0.000000e+00 : f32
    %17 = vector.broadcast %cst_7 : f32 to vector<4x2xf32>
    %18 = vector.extract_strided_slice %8 {offsets = [0, 0], sizes = [4, 14], strides = [1, 1]} : vector<4x16xf32> to vector<4x14xf32>
    %19 = tpu.concatenate %17, %18 in 1 : vector<4x2xf32>, vector<4x14xf32> -> vector<4x16xf32>
    %c1 = arith.constant 1 : index
    %c0_8 = arith.constant 0 : index
    %c0_9 = arith.constant 0 : index
    %20 = vector.load %arg2[%c1, %c0_8, %c0_9] : memref<5x32x4xf32, #tpu.memory_space<vmem>>, vector<1x32x4xf32>
    %21 = vector.shape_cast %20 : vector<1x32x4xf32> to vector<32x4xf32>
    %cst_10 = arith.constant dense<0.000000e+00> : vector<32x16xf32>
    %22 = tpu.matmul %21, %19, %cst_10 {dimension_numbers = #tpu.dot_dimension_numbers<[1], [0], [0], [1], [0, 0, 1, 1], [], []>} : vector<32x4xf32>, vector<4x16xf32>, vector<32x16xf32> -> vector<32x16xf32>
    %23 = arith.addf %16, %22 : vector<32x16xf32>
    %c2 = arith.constant 2 : index
    %c0_11 = arith.constant 0 : index
    %c0_12 = arith.constant 0 : index
    %24 = vector.load %arg2[%c2, %c0_11, %c0_12] : memref<5x32x4xf32, #tpu.memory_space<vmem>>, vector<1x32x4xf32>
    %25 = vector.shape_cast %24 : vector<1x32x4xf32> to vector<32x4xf32>
    %cst_13 = arith.constant dense<0.000000e+00> : vector<32x16xf32>
    %26 = tpu.matmul %25, %8, %cst_13 {dimension_numbers = #tpu.dot_dimension_numbers<[1], [0], [0], [1], [0, 0, 1, 1], [], []>} : vector<32x4xf32>, vector<4x16xf32>, vector<32x16xf32> -> vector<32x16xf32>
    %27 = arith.addf %23, %26 : vector<32x16xf32>
    %cst_14 = arith.constant 0.000000e+00 : f32
    %28 = vector.broadcast %cst_14 : f32 to vector<4x2xf32>
    %29 = vector.extract_strided_slice %8 {offsets = [0, 2], sizes = [4, 14], strides = [1, 1]} : vector<4x16xf32> to vector<4x14xf32>
    %30 = tpu.concatenate %29, %28 in 1 : vector<4x14xf32>, vector<4x2xf32> -> vector<4x16xf32>
    %c3 = arith.constant 3 : index
    %c0_15 = arith.constant 0 : index
    %c0_16 = arith.constant 0 : index
    %31 = vector.load %arg2[%c3, %c0_15, %c0_16] : memref<5x32x4xf32, #tpu.memory_space<vmem>>, vector<1x32x4xf32>
    %32 = vector.shape_cast %31 : vector<1x32x4xf32> to vector<32x4xf32>
    %cst_17 = arith.constant dense<0.000000e+00> : vector<32x16xf32>
    %33 = tpu.matmul %32, %30, %cst_17 {dimension_numbers = #tpu.dot_dimension_numbers<[1], [0], [0], [1], [0, 0, 1, 1], [], []>} : vector<32x4xf32>, vector<4x16xf32>, vector<32x16xf32> -> vector<32x16xf32>
    %34 = arith.addf %27, %33 : vector<32x16xf32>
    %cst_18 = arith.constant 0.000000e+00 : f32
    %35 = vector.broadcast %cst_18 : f32 to vector<4x4xf32>
    %36 = vector.extract_strided_slice %8 {offsets = [0, 4], sizes = [4, 12], strides = [1, 1]} : vector<4x16xf32> to vector<4x12xf32>
    %37 = tpu.concatenate %36, %35 in 1 : vector<4x12xf32>, vector<4x4xf32> -> vector<4x16xf32>
    %c4 = arith.constant 4 : index
    %c0_19 = arith.constant 0 : index
    %c0_20 = arith.constant 0 : index
    %38 = vector.load %arg2[%c4, %c0_19, %c0_20] : memref<5x32x4xf32, #tpu.memory_space<vmem>>, vector<1x32x4xf32>
    %39 = vector.shape_cast %38 : vector<1x32x4xf32> to vector<32x4xf32>
    %cst_21 = arith.constant dense<0.000000e+00> : vector<32x16xf32>
    %40 = tpu.matmul %39, %37, %cst_21 {dimension_numbers = #tpu.dot_dimension_numbers<[1], [0], [0], [1], [0, 0, 1, 1], [], []>} : vector<32x4xf32>, vector<4x16xf32>, vector<32x16xf32> -> vector<32x16xf32>
    %41 = arith.addf %34, %40 : vector<32x16xf32>
    %c0_22 = arith.constant 0 : index
    %c0_23 = arith.constant 0 : index
    %42 = vector.load %arg3[%c0_22, %c0_23] : memref<32x1xf32, #tpu.memory_space<vmem>>, vector<32x1xf32>
    %43 = vector.broadcast %42 : vector<32x1xf32> to vector<32x16xf32>
    %44 = arith.addf %41, %43 : vector<32x16xf32>
    %cst_24 = arith.constant 0.000000e+00 : f32
    %45 = vector.broadcast %cst_24 : f32 to vector<32x1xf32>
    %46 = vector.extract_strided_slice %44 {offsets = [0, 1], sizes = [32, 15], strides = [1, 1]} : vector<32x16xf32> to vector<32x15xf32>
    %47 = tpu.concatenate %46, %45 in 1 : vector<32x15xf32>, vector<32x1xf32> -> vector<32x16xf32>
    %48 = arith.maximumf %44, %47 : vector<32x16xf32>
    %cst_25 = arith.constant dense<0.000000e+00> : vector<32x8xf32>
    %49 = tpu.matmul %48, %6, %cst_25 {dimension_numbers = #tpu.dot_dimension_numbers<[1], [0], [0], [1], [0, 0, 1, 1], [], []>} : vector<32x16xf32>, vector<16x8xf32>, vector<32x8xf32> -> vector<32x8xf32>
    %cst_26 = arith.constant 0.000000e+00 : f32
    %50 = vector.broadcast %cst_26 : f32 to vector<32x8xf32>
    %51 = arith.maximumf %49, %50 : vector<32x8xf32>
    %cst_27 = arith.constant 0.000000e+00 : f32
    %52 = vector.broadcast %cst_27 : f32 to vector<32x8xf32>
    %cst_28 = arith.constant 0.000000e+00 : f32
    %53 = vector.broadcast %cst_28 : f32 to vector<32x4xf32>
    %54 = vector.extract_strided_slice %51 {offsets = [0, 0], sizes = [32, 4], strides = [1, 1]} : vector<32x8xf32> to vector<32x4xf32>
    %55 = tpu.concatenate %53, %54 in 1 : vector<32x4xf32>, vector<32x4xf32> -> vector<32x8xf32>
    %c0_29 = arith.constant 0 : index
    %c0_30 = arith.constant 0 : index
    %c0_31 = arith.constant 0 : index
    %56 = vector.load %arg4[%c0_29, %c0_30, %c0_31] : memref<5x32x32xf32, #tpu.memory_space<vmem>>, vector<1x32x32xf32>
    %57 = vector.shape_cast %56 : vector<1x32x32xf32> to vector<32x32xf32>
    %cst_32 = arith.constant dense<0.000000e+00> : vector<32x8xf32>
    %58 = tpu.matmul %57, %55, %cst_32 {dimension_numbers = #tpu.dot_dimension_numbers<[1], [0], [0], [1], [0, 0, 1, 1], [], []>} : vector<32x32xf32>, vector<32x8xf32>, vector<32x8xf32> -> vector<32x8xf32>
    %59 = arith.addf %52, %58 : vector<32x8xf32>
    %cst_33 = arith.constant 0.000000e+00 : f32
    %60 = vector.broadcast %cst_33 : f32 to vector<32x2xf32>
    %61 = vector.extract_strided_slice %51 {offsets = [0, 0], sizes = [32, 6], strides = [1, 1]} : vector<32x8xf32> to vector<32x6xf32>
    %62 = tpu.concatenate %60, %61 in 1 : vector<32x2xf32>, vector<32x6xf32> -> vector<32x8xf32>
    %c1_34 = arith.constant 1 : index
    %c0_35 = arith.constant 0 : index
    %c0_36 = arith.constant 0 : index
    %63 = vector.load %arg4[%c1_34, %c0_35, %c0_36] : memref<5x32x32xf32, #tpu.memory_space<vmem>>, vector<1x32x32xf32>
    %64 = vector.shape_cast %63 : vector<1x32x32xf32> to vector<32x32xf32>
    %cst_37 = arith.constant dense<0.000000e+00> : vector<32x8xf32>
    %65 = tpu.matmul %64, %62, %cst_37 {dimension_numbers = #tpu.dot_dimension_numbers<[1], [0], [0], [1], [0, 0, 1, 1], [], []>} : vector<32x32xf32>, vector<32x8xf32>, vector<32x8xf32> -> vector<32x8xf32>
    %66 = arith.addf %59, %65 : vector<32x8xf32>
    %c2_38 = arith.constant 2 : index
    %c0_39 = arith.constant 0 : index
    %c0_40 = arith.constant 0 : index
    %67 = vector.load %arg4[%c2_38, %c0_39, %c0_40] : memref<5x32x32xf32, #tpu.memory_space<vmem>>, vector<1x32x32xf32>
    %68 = vector.shape_cast %67 : vector<1x32x32xf32> to vector<32x32xf32>
    %cst_41 = arith.constant dense<0.000000e+00> : vector<32x8xf32>
    %69 = tpu.matmul %68, %51, %cst_41 {dimension_numbers = #tpu.dot_dimension_numbers<[1], [0], [0], [1], [0, 0, 1, 1], [], []>} : vector<32x32xf32>, vector<32x8xf32>, vector<32x8xf32> -> vector<32x8xf32>
    %70 = arith.addf %66, %69 : vector<32x8xf32>
    %cst_42 = arith.constant 0.000000e+00 : f32
    %71 = vector.broadcast %cst_42 : f32 to vector<32x2xf32>
    %72 = vector.extract_strided_slice %51 {offsets = [0, 2], sizes = [32, 6], strides = [1, 1]} : vector<32x8xf32> to vector<32x6xf32>
    %73 = tpu.concatenate %72, %71 in 1 : vector<32x6xf32>, vector<32x2xf32> -> vector<32x8xf32>
    %c3_43 = arith.constant 3 : index
    %c0_44 = arith.constant 0 : index
    %c0_45 = arith.constant 0 : index
    %74 = vector.load %arg4[%c3_43, %c0_44, %c0_45] : memref<5x32x32xf32, #tpu.memory_space<vmem>>, vector<1x32x32xf32>
    %75 = vector.shape_cast %74 : vector<1x32x32xf32> to vector<32x32xf32>
    %cst_46 = arith.constant dense<0.000000e+00> : vector<32x8xf32>
    %76 = tpu.matmul %75, %73, %cst_46 {dimension_numbers = #tpu.dot_dimension_numbers<[1], [0], [0], [1], [0, 0, 1, 1], [], []>} : vector<32x32xf32>, vector<32x8xf32>, vector<32x8xf32> -> vector<32x8xf32>
    %77 = arith.addf %70, %76 : vector<32x8xf32>
    %cst_47 = arith.constant 0.000000e+00 : f32
    %78 = vector.broadcast %cst_47 : f32 to vector<32x4xf32>
    %79 = vector.extract_strided_slice %51 {offsets = [0, 4], sizes = [32, 4], strides = [1, 1]} : vector<32x8xf32> to vector<32x4xf32>
    %80 = tpu.concatenate %79, %78 in 1 : vector<32x4xf32>, vector<32x4xf32> -> vector<32x8xf32>
    %c4_48 = arith.constant 4 : index
    %c0_49 = arith.constant 0 : index
    %c0_50 = arith.constant 0 : index
    %81 = vector.load %arg4[%c4_48, %c0_49, %c0_50] : memref<5x32x32xf32, #tpu.memory_space<vmem>>, vector<1x32x32xf32>
    %82 = vector.shape_cast %81 : vector<1x32x32xf32> to vector<32x32xf32>
    %cst_51 = arith.constant dense<0.000000e+00> : vector<32x8xf32>
    %83 = tpu.matmul %82, %80, %cst_51 {dimension_numbers = #tpu.dot_dimension_numbers<[1], [0], [0], [1], [0, 0, 1, 1], [], []>} : vector<32x32xf32>, vector<32x8xf32>, vector<32x8xf32> -> vector<32x8xf32>
    %84 = arith.addf %77, %83 : vector<32x8xf32>
    %c0_52 = arith.constant 0 : index
    %c0_53 = arith.constant 0 : index
    %85 = vector.load %arg5[%c0_52, %c0_53] : memref<32x1xf32, #tpu.memory_space<vmem>>, vector<32x1xf32>
    %86 = vector.broadcast %85 : vector<32x1xf32> to vector<32x8xf32>
    %87 = arith.addf %84, %86 : vector<32x8xf32>
    %cst_54 = arith.constant 0.000000e+00 : f32
    %88 = vector.broadcast %cst_54 : f32 to vector<32x8xf32>
    %89 = arith.maximumf %87, %88 : vector<32x8xf32>
    %cst_55 = arith.constant 0.000000e+00 : f32
    %90 = vector.broadcast %cst_55 : f32 to vector<32x8xf32>
    %cst_56 = arith.constant 0.000000e+00 : f32
    %91 = vector.broadcast %cst_56 : f32 to vector<32x4xf32>
    %92 = vector.extract_strided_slice %89 {offsets = [0, 0], sizes = [32, 4], strides = [1, 1]} : vector<32x8xf32> to vector<32x4xf32>
    %93 = tpu.concatenate %91, %92 in 1 : vector<32x4xf32>, vector<32x4xf32> -> vector<32x8xf32>
    %c0_57 = arith.constant 0 : index
    %c0_58 = arith.constant 0 : index
    %c0_59 = arith.constant 0 : index
    %94 = vector.load %arg6[%c0_57, %c0_58, %c0_59] : memref<5x32x32xf32, #tpu.memory_space<vmem>>, vector<1x32x32xf32>
    %95 = vector.shape_cast %94 : vector<1x32x32xf32> to vector<32x32xf32>
    %cst_60 = arith.constant dense<0.000000e+00> : vector<32x8xf32>
    %96 = tpu.matmul %95, %93, %cst_60 {dimension_numbers = #tpu.dot_dimension_numbers<[1], [0], [0], [1], [0, 0, 1, 1], [], []>} : vector<32x32xf32>, vector<32x8xf32>, vector<32x8xf32> -> vector<32x8xf32>
    %97 = arith.addf %90, %96 : vector<32x8xf32>
    %cst_61 = arith.constant 0.000000e+00 : f32
    %98 = vector.broadcast %cst_61 : f32 to vector<32x2xf32>
    %99 = vector.extract_strided_slice %89 {offsets = [0, 0], sizes = [32, 6], strides = [1, 1]} : vector<32x8xf32> to vector<32x6xf32>
    %100 = tpu.concatenate %98, %99 in 1 : vector<32x2xf32>, vector<32x6xf32> -> vector<32x8xf32>
    %c1_62 = arith.constant 1 : index
    %c0_63 = arith.constant 0 : index
    %c0_64 = arith.constant 0 : index
    %101 = vector.load %arg6[%c1_62, %c0_63, %c0_64] : memref<5x32x32xf32, #tpu.memory_space<vmem>>, vector<1x32x32xf32>
    %102 = vector.shape_cast %101 : vector<1x32x32xf32> to vector<32x32xf32>
    %cst_65 = arith.constant dense<0.000000e+00> : vector<32x8xf32>
    %103 = tpu.matmul %102, %100, %cst_65 {dimension_numbers = #tpu.dot_dimension_numbers<[1], [0], [0], [1], [0, 0, 1, 1], [], []>} : vector<32x32xf32>, vector<32x8xf32>, vector<32x8xf32> -> vector<32x8xf32>
    %104 = arith.addf %97, %103 : vector<32x8xf32>
    %c2_66 = arith.constant 2 : index
    %c0_67 = arith.constant 0 : index
    %c0_68 = arith.constant 0 : index
    %105 = vector.load %arg6[%c2_66, %c0_67, %c0_68] : memref<5x32x32xf32, #tpu.memory_space<vmem>>, vector<1x32x32xf32>
    %106 = vector.shape_cast %105 : vector<1x32x32xf32> to vector<32x32xf32>
    %cst_69 = arith.constant dense<0.000000e+00> : vector<32x8xf32>
    %107 = tpu.matmul %106, %89, %cst_69 {dimension_numbers = #tpu.dot_dimension_numbers<[1], [0], [0], [1], [0, 0, 1, 1], [], []>} : vector<32x32xf32>, vector<32x8xf32>, vector<32x8xf32> -> vector<32x8xf32>
    %108 = arith.addf %104, %107 : vector<32x8xf32>
    %cst_70 = arith.constant 0.000000e+00 : f32
    %109 = vector.broadcast %cst_70 : f32 to vector<32x2xf32>
    %110 = vector.extract_strided_slice %89 {offsets = [0, 2], sizes = [32, 6], strides = [1, 1]} : vector<32x8xf32> to vector<32x6xf32>
    %111 = tpu.concatenate %110, %109 in 1 : vector<32x6xf32>, vector<32x2xf32> -> vector<32x8xf32>
    %c3_71 = arith.constant 3 : index
    %c0_72 = arith.constant 0 : index
    %c0_73 = arith.constant 0 : index
    %112 = vector.load %arg6[%c3_71, %c0_72, %c0_73] : memref<5x32x32xf32, #tpu.memory_space<vmem>>, vector<1x32x32xf32>
    %113 = vector.shape_cast %112 : vector<1x32x32xf32> to vector<32x32xf32>
    %cst_74 = arith.constant dense<0.000000e+00> : vector<32x8xf32>
    %114 = tpu.matmul %113, %111, %cst_74 {dimension_numbers = #tpu.dot_dimension_numbers<[1], [0], [0], [1], [0, 0, 1, 1], [], []>} : vector<32x32xf32>, vector<32x8xf32>, vector<32x8xf32> -> vector<32x8xf32>
    %115 = arith.addf %108, %114 : vector<32x8xf32>
    %cst_75 = arith.constant 0.000000e+00 : f32
    %116 = vector.broadcast %cst_75 : f32 to vector<32x4xf32>
    %117 = vector.extract_strided_slice %89 {offsets = [0, 4], sizes = [32, 4], strides = [1, 1]} : vector<32x8xf32> to vector<32x4xf32>
    %118 = tpu.concatenate %117, %116 in 1 : vector<32x4xf32>, vector<32x4xf32> -> vector<32x8xf32>
    %c4_76 = arith.constant 4 : index
    %c0_77 = arith.constant 0 : index
    %c0_78 = arith.constant 0 : index
    %119 = vector.load %arg6[%c4_76, %c0_77, %c0_78] : memref<5x32x32xf32, #tpu.memory_space<vmem>>, vector<1x32x32xf32>
    %120 = vector.shape_cast %119 : vector<1x32x32xf32> to vector<32x32xf32>
    %cst_79 = arith.constant dense<0.000000e+00> : vector<32x8xf32>
    %121 = tpu.matmul %120, %118, %cst_79 {dimension_numbers = #tpu.dot_dimension_numbers<[1], [0], [0], [1], [0, 0, 1, 1], [], []>} : vector<32x32xf32>, vector<32x8xf32>, vector<32x8xf32> -> vector<32x8xf32>
    %122 = arith.addf %115, %121 : vector<32x8xf32>
    %c0_80 = arith.constant 0 : index
    %c0_81 = arith.constant 0 : index
    %123 = vector.load %arg7[%c0_80, %c0_81] : memref<32x1xf32, #tpu.memory_space<vmem>>, vector<32x1xf32>
    %124 = vector.broadcast %123 : vector<32x1xf32> to vector<32x8xf32>
    %125 = arith.addf %122, %124 : vector<32x8xf32>
    %cst_82 = arith.constant 0.000000e+00 : f32
    %126 = vector.broadcast %cst_82 : f32 to vector<32x8xf32>
    %127 = arith.maximumf %125, %126 : vector<32x8xf32>
    %cst_83 = arith.constant 0.000000e+00 : f32
    %128 = vector.broadcast %cst_83 : f32 to vector<32x8xf32>
    %cst_84 = arith.constant 0.000000e+00 : f32
    %129 = vector.broadcast %cst_84 : f32 to vector<32x4xf32>
    %130 = vector.extract_strided_slice %127 {offsets = [0, 0], sizes = [32, 4], strides = [1, 1]} : vector<32x8xf32> to vector<32x4xf32>
    %131 = tpu.concatenate %129, %130 in 1 : vector<32x4xf32>, vector<32x4xf32> -> vector<32x8xf32>
    %c0_85 = arith.constant 0 : index
    %c0_86 = arith.constant 0 : index
    %c0_87 = arith.constant 0 : index
    %132 = vector.load %arg8[%c0_85, %c0_86, %c0_87] : memref<5x32x32xf32, #tpu.memory_space<vmem>>, vector<1x32x32xf32>
    %133 = vector.shape_cast %132 : vector<1x32x32xf32> to vector<32x32xf32>
    %cst_88 = arith.constant dense<0.000000e+00> : vector<32x8xf32>
    %134 = tpu.matmul %133, %131, %cst_88 {dimension_numbers = #tpu.dot_dimension_numbers<[1], [0], [0], [1], [0, 0, 1, 1], [], []>} : vector<32x32xf32>, vector<32x8xf32>, vector<32x8xf32> -> vector<32x8xf32>
    %135 = arith.addf %128, %134 : vector<32x8xf32>
    %cst_89 = arith.constant 0.000000e+00 : f32
    %136 = vector.broadcast %cst_89 : f32 to vector<32x2xf32>
    %137 = vector.extract_strided_slice %127 {offsets = [0, 0], sizes = [32, 6], strides = [1, 1]} : vector<32x8xf32> to vector<32x6xf32>
    %138 = tpu.concatenate %136, %137 in 1 : vector<32x2xf32>, vector<32x6xf32> -> vector<32x8xf32>
    %c1_90 = arith.constant 1 : index
    %c0_91 = arith.constant 0 : index
    %c0_92 = arith.constant 0 : index
    %139 = vector.load %arg8[%c1_90, %c0_91, %c0_92] : memref<5x32x32xf32, #tpu.memory_space<vmem>>, vector<1x32x32xf32>
    %140 = vector.shape_cast %139 : vector<1x32x32xf32> to vector<32x32xf32>
    %cst_93 = arith.constant dense<0.000000e+00> : vector<32x8xf32>
    %141 = tpu.matmul %140, %138, %cst_93 {dimension_numbers = #tpu.dot_dimension_numbers<[1], [0], [0], [1], [0, 0, 1, 1], [], []>} : vector<32x32xf32>, vector<32x8xf32>, vector<32x8xf32> -> vector<32x8xf32>
    %142 = arith.addf %135, %141 : vector<32x8xf32>
    %c2_94 = arith.constant 2 : index
    %c0_95 = arith.constant 0 : index
    %c0_96 = arith.constant 0 : index
    %143 = vector.load %arg8[%c2_94, %c0_95, %c0_96] : memref<5x32x32xf32, #tpu.memory_space<vmem>>, vector<1x32x32xf32>
    %144 = vector.shape_cast %143 : vector<1x32x32xf32> to vector<32x32xf32>
    %cst_97 = arith.constant dense<0.000000e+00> : vector<32x8xf32>
    %145 = tpu.matmul %144, %127, %cst_97 {dimension_numbers = #tpu.dot_dimension_numbers<[1], [0], [0], [1], [0, 0, 1, 1], [], []>} : vector<32x32xf32>, vector<32x8xf32>, vector<32x8xf32> -> vector<32x8xf32>
    %146 = arith.addf %142, %145 : vector<32x8xf32>
    %cst_98 = arith.constant 0.000000e+00 : f32
    %147 = vector.broadcast %cst_98 : f32 to vector<32x2xf32>
    %148 = vector.extract_strided_slice %127 {offsets = [0, 2], sizes = [32, 6], strides = [1, 1]} : vector<32x8xf32> to vector<32x6xf32>
    %149 = tpu.concatenate %148, %147 in 1 : vector<32x6xf32>, vector<32x2xf32> -> vector<32x8xf32>
    %c3_99 = arith.constant 3 : index
    %c0_100 = arith.constant 0 : index
    %c0_101 = arith.constant 0 : index
    %150 = vector.load %arg8[%c3_99, %c0_100, %c0_101] : memref<5x32x32xf32, #tpu.memory_space<vmem>>, vector<1x32x32xf32>
    %151 = vector.shape_cast %150 : vector<1x32x32xf32> to vector<32x32xf32>
    %cst_102 = arith.constant dense<0.000000e+00> : vector<32x8xf32>
    %152 = tpu.matmul %151, %149, %cst_102 {dimension_numbers = #tpu.dot_dimension_numbers<[1], [0], [0], [1], [0, 0, 1, 1], [], []>} : vector<32x32xf32>, vector<32x8xf32>, vector<32x8xf32> -> vector<32x8xf32>
    %153 = arith.addf %146, %152 : vector<32x8xf32>
    %cst_103 = arith.constant 0.000000e+00 : f32
    %154 = vector.broadcast %cst_103 : f32 to vector<32x4xf32>
    %155 = vector.extract_strided_slice %127 {offsets = [0, 4], sizes = [32, 4], strides = [1, 1]} : vector<32x8xf32> to vector<32x4xf32>
    %156 = tpu.concatenate %155, %154 in 1 : vector<32x4xf32>, vector<32x4xf32> -> vector<32x8xf32>
    %c4_104 = arith.constant 4 : index
    %c0_105 = arith.constant 0 : index
    %c0_106 = arith.constant 0 : index
    %157 = vector.load %arg8[%c4_104, %c0_105, %c0_106] : memref<5x32x32xf32, #tpu.memory_space<vmem>>, vector<1x32x32xf32>
    %158 = vector.shape_cast %157 : vector<1x32x32xf32> to vector<32x32xf32>
    %cst_107 = arith.constant dense<0.000000e+00> : vector<32x8xf32>
    %159 = tpu.matmul %158, %156, %cst_107 {dimension_numbers = #tpu.dot_dimension_numbers<[1], [0], [0], [1], [0, 0, 1, 1], [], []>} : vector<32x32xf32>, vector<32x8xf32>, vector<32x8xf32> -> vector<32x8xf32>
    %160 = arith.addf %153, %159 : vector<32x8xf32>
    %c0_108 = arith.constant 0 : index
    %c0_109 = arith.constant 0 : index
    %161 = vector.load %arg9[%c0_108, %c0_109] : memref<32x1xf32, #tpu.memory_space<vmem>>, vector<32x1xf32>
    %162 = vector.broadcast %161 : vector<32x1xf32> to vector<32x8xf32>
    %163 = arith.addf %160, %162 : vector<32x8xf32>
    %cst_110 = arith.constant 0.000000e+00 : f32
    %164 = vector.broadcast %cst_110 : f32 to vector<32x8xf32>
    %165 = arith.maximumf %163, %164 : vector<32x8xf32>
    %c0_111 = arith.constant 0 : index
    %c0_112 = arith.constant 0 : index
    %c0_113 = arith.constant 0 : index
    %166 = vector.load %arg10[%c0_111, %c0_112, %c0_113] : memref<1x32x8xf32, #tpu.memory_space<vmem>>, vector<1x32x8xf32>
    %167 = vector.shape_cast %166 : vector<1x32x8xf32> to vector<32x8xf32>
    %168 = vector.shape_cast %165 : vector<32x8xf32> to vector<1x32x8xf32>
    tpu.vector_store %arg10[%c0_111, %c0_112, %c0_113], %168 {strides = array<i32>} : memref<1x32x8xf32, #tpu.memory_space<vmem>>, vector<1x32x8xf32>,
    return
  }
  func.func @transform_0(%arg0: i32) -> (i32, i32, i32) {
    %c0_i32 = arith.constant 0 : i32
    %c0_i32_0 = arith.constant 0 : i32
    %c0_i32_1 = arith.constant 0 : i32
    return %arg0, %c0_i32, %c0_i32_0 : i32, i32, i32
  }
  func.func @transform_1(%arg0: i32) -> (i32, i32, i32) {
    %c0_i32 = arith.constant 0 : i32
    %c0_i32_0 = arith.constant 0 : i32
    %c0_i32_1 = arith.constant 0 : i32
    %c0_i32_2 = arith.constant 0 : i32
    return %c0_i32, %c0_i32_0, %c0_i32_1 : i32, i32, i32
  }
  func.func @transform_2(%arg0: i32) -> (i32, i32) {
    %c0_i32 = arith.constant 0 : i32
    %c0_i32_0 = arith.constant 0 : i32
    %c0_i32_1 = arith.constant 0 : i32
    return %c0_i32, %c0_i32_0 : i32, i32
  }
  func.func @transform_3(%arg0: i32) -> (i32, i32, i32) {
    %c0_i32 = arith.constant 0 : i32
    %c0_i32_0 = arith.constant 0 : i32
    %c0_i32_1 = arith.constant 0 : i32
    %c0_i32_2 = arith.constant 0 : i32
    return %c0_i32, %c0_i32_0, %c0_i32_1 : i32, i32, i32
  }
  func.func @transform_4(%arg0: i32) -> (i32, i32) {
    %c0_i32 = arith.constant 0 : i32
    %c0_i32_0 = arith.constant 0 : i32
    %c0_i32_1 = arith.constant 0 : i32
    return %c0_i32, %c0_i32_0 : i32, i32
  }
  func.func @transform_5(%arg0: i32) -> (i32, i32, i32) {
    %c0_i32 = arith.constant 0 : i32
    %c0_i32_0 = arith.constant 0 : i32
    %c0_i32_1 = arith.constant 0 : i32
    %c0_i32_2 = arith.constant 0 : i32
    return %c0_i32, %c0_i32_0, %c0_i32_1 : i32, i32, i32
  }
  func.func @transform_6(%arg0: i32) -> (i32, i32) {
    %c0_i32 = arith.constant 0 : i32
    %c0_i32_0 = arith.constant 0 : i32
    %c0_i32_1 = arith.constant 0 : i32
    return %c0_i32, %c0_i32_0 : i32, i32
  }
  func.func @transform_7(%arg0: i32) -> (i32, i32, i32) {
    %c0_i32 = arith.constant 0 : i32
    %c0_i32_0 = arith.constant 0 : i32
    %c0_i32_1 = arith.constant 0 : i32
    %c0_i32_2 = arith.constant 0 : i32
    return %c0_i32, %c0_i32_0, %c0_i32_1 : i32, i32, i32
  }
  func.func @transform_8(%arg0: i32) -> (i32, i32) {
    %c0_i32 = arith.constant 0 : i32
    %c0_i32_0 = arith.constant 0 : i32
    %c0_i32_1 = arith.constant 0 : i32
    return %c0_i32, %c0_i32_0 : i32, i32
  }
  func.func @transform_9(%arg0: i32) -> (i32, i32, i32) {
    %c0_i32 = arith.constant 0 : i32
    %c0_i32_0 = arith.constant 0 : i32
    %c0_i32_1 = arith.constant 0 : i32
    return %arg0, %c0_i32, %c0_i32_0 : i32, i32, i32
  }
}

</mosaic_0001>

<bundles_post_ra>
// kernel: tpu_custom_call.1
= control target key start
LH: loop header
LB: loop body
LE: loop exit
PB: predicated region body
PF: predicated region fallthrough
CT: control target
= control target key end

     0   :  { %14 = vsyncpa [#allocation3], 0  ;;  %s4590_s0 = inlined_call_operand.hbm [shape: f32[2,4,16], index: 0, kind: input, shape index: {}]   ;;  %s4591_s1 = inlined_call_operand.vmem [shape: f32[5,32,4], index: 1, kind: input, shape index: {}]   ;;  %s4592_s2 = inlined_call_operand.vmem [shape: f32[32,1], index: 2, kind: input, shape index: {}]   ;;  %s4593_s3 = inlined_call_operand.vmem [shape: f32[5,32,32], index: 3, kind: input, shape index: {}]   ;;  %s4594_s4 = inlined_call_operand.vmem [shape: f32[32,1], index: 4, kind: input, shape index: {}]   ;;  %s4595_s5 = inlined_call_operand.vmem [shape: f32[5,32,32], index: 5, kind: input, shape index: {}]   ;;  %s4596_s6 = inlined_call_operand.vmem [shape: f32[32,1], index: 6, kind: input, shape index: {}]   ;;  %s4597_s7 = inlined_call_operand.hbm [shape: f32[5,32,32], index: 7, kind: input, shape index: {}]   ;;  %s4598_s8 = inlined_call_operand.vmem [shape: f32[32,1], index: 8, kind: input, shape index: {}]   ;;  %s4599_s9 = inlined_call_operand.vmem [shape: f32[2,32,8], index: 9, kind: output, shape index: {}]  }
   0x1   :  { %16 = vsyncpa [#allocation3 + $0x1], 0 }
   0x2   :  { %17 = vsyncpa [#allocation5], 0  ;;  %s3893_s30 = smov 0   ;;  %s3895_s10 = smov 0  }
   0x3   :  { %s3897_s11 = smov 0   ;;  %s3899_s12 = smov 0  }
   0x4 LB: > { %s3912_s13 = sadd.s32 4294967295, %s3830_s12   ;;  %p43_p0 = scmp.ne.s32.totalorder %s3822_s10, %s3818_s30  ;;  %s3830_s12 = sphi %s3899_s12, %s4618_s12   ;;  %s3826_s11 = sphi %s3897_s11, %s4621_s11   ;;  %s3822_s10 = sphi %s3895_s10, %s4620_s10   ;;  %s3818_s30 = sphi %s3893_s30, %s4619_s30  }
   0x5   : > { %p4602_p1 = scmp.eq.s32.totalorder %s3912_s13, 0  ;;  %p3038_p2 = scmp.ge.s32.totalorder %s3830_s12, 1 }
   0x6   : > { %p248_p3 = scmp.lt.s32.totalorder %s3830_s12, 3  ;;  %s3832_s16 = smov [#allocation4]  }
   0x7   : > { %p3920_p4 = por %p4602_p1, %p43_p0  ;;  %s278_s17 = sshll.u32 %s3832_s16, 4  ;;  %s279_s17 = int_to_ptr.vmem [resolvable:$true] %s278_s17 }
   0x8   : > { %p3924_p5 = pnand %p3038_p2, %p248_p3  ;;  %s3937_s19 = sadd.s32 1, %s3830_s12  }
   0x9   : > { %s4605_s14 = scalar_select %p3920_p4, 1, 0 }
   0xa   : > { %s4606_s15 = scalar_select %p3924_p5, 1, 0 }
   0xb   : > { %p3683_p6 = pneg %p3924_p5  ;;  %4608 = sst [smem:[#allocation8_spill]] %s3937_s19 }
   0xc   : > { %s30_s20 = sadd.s32 1, %s3826_s11  ;;  %s27_s21 = ssub.s32 %s3830_s12, %s3937_s19 }
   0xd   : > { %p3932_p7 = pnand %p3683_p6, %p4602_p1  ;;  %s3749_s22 = scalar_lea.vmem %s279_s17, 2560 }
   0xe   : > { %p3750_p9 = scmp.ne.s32.totalorder %s279_s17, %s3749_s22  ;;  %p3757_p12 = scmp.lt.s32.totalorder %s279_s17, %s279_s17 }
   0xf   : > { %p3740_p8 = pneg %p3932_p7  ;;  %p3758_p13 = scmp.lt.s32.totalorder %s3749_s22, %s3749_s22 }
  0x11   : > { %p3752_p10 = pnand %p3750_p9, %p3740_p8  ;;  %p3759_p0 = por %p3758_p13, %p3757_p12 }
  0x13   : > { %p3753_p11 = pneg %p3752_p10 }
  0x15   : > { %p3760_p2 = pnand %p3759_p0, %p3753_p11 }
  0x17   : > { %3763 = shalt.err (!%p3760_p2)
}
  0x18   : > { %s3833_s23 = smov 128   ;;  %s3834_s24 = smov 8  }
  0x19   : > { %3686 = dma.hbm_to_vmem [thread:$0]  (!%p3932_p7), %s4597_s7, 2560, %s279_s17, [#allocation5], %s3833_s23, %s3833_s23, %s3834_s24  }
  0x1a   : > { %p28_p3 = scmp.eq.s32.totalorder %s27_s21, 0  ;;  %p37_p6 = scmp.ne.s32.totalorder %s3826_s11, %s3822_s10 }
  0x1b   : > { %p38_p8 = scmp.eq.s32.totalorder %s3830_s12, 0  ;;  %p3692_p9 = scmp.lt.s32.totalorder %s3830_s12, 2 }
  0x1c   : > { %s3954_s27 = scalar_select %p28_p3, %s3826_s11, %s30_s20  }
  0x1d   : > { %p39_p10 = por %p38_p8, %p37_p6  ;;  %s295_s28 = sand.u32 1, %s3826_s11  }
  0x1e   : > { %s3041_s29 = sshll.u32 %s295_s28, 2  ;;  %s3042_s30 = sshll.u32 %s3830_s12, 6 }
  0x1f   : > { %s3961_s19 = scalar_lea.hbm %s4590_s0, %s3042_s30  ;;  %s299_s18 = scalar_lea.vmem [#allocation2], %s3041_s29 }
  0x20   : > { %s306_s17 = sshll.u32 %s299_s18, 4  ;;  %p3963_p7 = pnand %p3692_p9, %p39_p10  ;;  %s307_s17 = int_to_ptr.vmem [resolvable:$true] %s306_s17 }
  0x21   : > { %s296_s20 = scalar_lea.sflag [#allocation3], %s295_s28  ;;  %s3764_s23 = scalar_lea.hbm %s3961_s19, 64 }
  0x22   : > { %p3765_p11 = scmp.ne.s32.totalorder %s3961_s19, %s3764_s23  ;;  %p3766_p12 = pneg %p3963_p7 }
  0x23   : > { %s3769_s25 = scalar_lea.hbm %s4590_s0, 128  ;;  %p3770_p2 = scmp.lt.s32.totalorder %s3961_s19, %s4590_s0 }
  0x24   : > { %p3767_p13 = pnand %p3766_p12, %p3765_p11  ;;  %p3771_p3 = scmp.lt.s32.totalorder %s3769_s25, %s3764_s23 }
  0x26   : > { %p3768_p0 = pneg %p3767_p13  ;;  %p3772_p6 = por %p3771_p3, %p3770_p2 }
  0x28   : > { %p3773_p8 = pnand %p3772_p6, %p3768_p0 }
  0x2a   : > { %3776 = shalt.err (!%p3773_p8)
}
  0x2b   : > { %s3777_s30 = scalar_lea.vmem %s307_s17, 64  ;;  %s3835_s28 = smov [#allocation2]  }
  0x2c   : > { %p3778_p9 = scmp.ne.s32.totalorder %s307_s17, %s3777_s30  ;;  %s3782_s16 = sshll.u32 %s3835_s28, 4  ;;  %s3783_s16 = int_to_ptr.vmem [resolvable:$false] %s3782_s16 }
  0x2d   : > { %s3784_s22 = scalar_lea.vmem %s3783_s16, 128  ;;  %p3785_p11 = scmp.lt.s32.totalorder %s307_s17, %s3783_s16 }
  0x2e   : > { %p3780_p10 = pnand %p3778_p9, %p3766_p12  ;;  %p3786_p13 = scmp.lt.s32.totalorder %s3784_s22, %s3777_s30 }
  0x30   : > { %p3781_p1 = pneg %p3780_p10  ;;  %p3787_p4 = por %p3786_p13, %p3785_p11 }
  0x32   : > { %p3788_p5 = pnand %p3787_p4, %p3781_p1 }
  0x34   : > { %3791 = shalt.err (!%p3788_p5)
}
  0x35   : > { %3690 = dma.hbm_to_vmem [thread:$0]  (!%p3963_p7), %s3961_s19, 64, %s307_s17, %s296_s20  }
  0x36   : > { %p4610_p0 = scmp.ne.s32.totalorder %s4606_s15, 0 }
  0x37   : > { %s317_s18 = sand.u32 (!%p4610_p0), 1, %s3822_s10   ;;  %p4611_p12 = scmp.ne.s32.totalorder (!%p4610_p0), %s4605_s14, 0 }
  0x38   : > { %315 = sbr.rel (%p4610_p0) target bundleno = 1774 (0x6ee), region = 56  ;;  %s3044_s23 = sshll.u32 (!%p4610_p0), %s317_s18, 2 }
  0x39   : > { %s318_s12 = scalar_lea.sflag (!%p4610_p0), [#allocation3], %s317_s18  ;;  %s321_s24 = scalar_lea.vmem (!%p4610_p0), [#allocation2], %s3044_s23 }
  0x3d   : > { %3809 = dma.done.wait (%p4611_p12), %s318_s12, 64  }
  0x3e   : > { %3811 = vsyncadd (%p4611_p12), %s318_s12, 4294967232  ;;  %p4612_p1 = scmp.eq.s32.totalorder %s3912_s13, 0 }
  0x40   : > { %3813 = dma.done.wait (%p4612_p1), [#allocation5], 2560   ;;  %p4613_p4 = pmov %p4612_p1 }
  0x41   : > { %vm382_vm0 = vcmask 31744   ;;  %v377_v0 = vld [vmem:[%s321_s24] sm:$0xf]  ;;  %v3052_v1 = vld [vmem:[%s4591_s1 + $0x30] sm:$0xff]  ;;  %s3836_s17 = smov 2   ;;  %s3837_s21 = smov 126   ;;  %v365_v38 = vlaneseq }
  0x42   : > { %3815 = vsyncadd (%p4613_p4), [#allocation5], 4294964736  ;;  %388 = vrot.lane.b32.xlu0 %v377_v0, %s3836_s17  ;;  %707 = vrot.lane.b32.xlu1 %v377_v0, %s3837_s21  ;;  %v3050_v2 = vld [vmem:[%s4591_s1 + $0x20] sm:$0xff]  ;;  %s3838_s25 = smov 4   ;;  %s3839_s26 = smov 124   ;;  %v936_v3 = vld [vmem:[%s4592_s2 + $0x8] sm:$0xff] }
  0x43   : > { %3420 = vmatprep.mubr.msk.f32.mxu1 %vm382_vm0, %v3052_v1  ;;  %3417 = vmatprep.mubr.msk.f32.mxu0 %vm382_vm0, %v3050_v2  ;;  %v935_v4 = vld [vmem:[%s4592_s2] sm:$0xff]  ;;  %v3840_v5 = vmov 0   ;;  %v938_v6 = vld [vmem:[%s4592_s2 + $0x18] sm:$0xff]  ;;  %v937_v7 = vld [vmem:[%s4592_s2 + $0x10] sm:$0xff]  ;;  %vm391_vm1 = vcmask 15360   ;;  %vm410_vm2 = vcmask 1043456  }
  0x44   : > { %3737 = vset.pattern.permute.xlu1 %v3840_v5  ;;  %3736 = vset.pattern.permute.xlu0 %v3840_v5  ;;  %v3053_v11 = vld [vmem:[%s4591_s1 + $0x38] sm:$0xff]  ;;  %v3051_v12 = vld [vmem:[%s4591_s1 + $0x28] sm:$0xff]  ;;  %vm710_vm3 = vcmask 113664   ;;  %v384_v13 = vld [vmem:[%s4591_s1] sm:$0xff]  ;;  %vm824_vm4 = vcmask 97280   ;;  %v366_v40 = vshrl.u32 %v365_v38, 7 }
  0x45   : > { %v3064_v16 = vld [vmem:[%s4591_s1 + $0x40] sm:$0xff]  ;;  %v385_v19 = vld [vmem:[%s4591_s1 + $0x8] sm:$0xff]  ;;  %v386_v22 = vld [vmem:[%s4591_s1 + $0x10] sm:$0xff]  ;;  %v369_v41 = vand.u32 127, %v365_v38  ;;  %v3841_v51 = vmov 1.0   ;;  %s3842_s18 = smov 127  }
  0x46   : > { %379 = vrot.lane.b32.xlu0 %v377_v0, %s3838_s25  ;;  %821 = vrot.lane.b32.xlu1 %v377_v0, %s3839_s26  ;;  %v3065_v20 = vld [vmem:[%s4591_s1 + $0x48] sm:$0xff]  ;;  %v3066_v23 = vld [vmem:[%s4591_s1 + $0x50] sm:$0xff]  ;;  %v367_v44 = vadd.s32 8, %v366_v40  ;;  %vm979_vm7 = vcmask 121856   ;;  %vm988_vm8 = vcmask 130048   ;;  %vm1135_vm9 = vcmask 261120   ;;  %vm4151_vm10 = vmneg %vm382_vm0 }
  0x47   : > { %v387_v24 = vld [vmem:[%s4591_s1 + $0x18] sm:$0xff]  ;;  %v3073_v26 = vld [vmem:[%s4591_s1 + $0x60] sm:$0xff]  ;;  %v3074_v28 = vld [vmem:[%s4591_s1 + $0x68] sm:$0xff]  ;;  %v370_v45 = vmul.u32 2, %v369_v41  ;;  %vm1448_vm12 = vcmask 48128   ;;  %p360_p5 = scmp.lt.s32.totalorder %s3912_s13, 1 }
  0x48   : > { %v3067_v25 = vld [vmem:[%s4591_s1 + $0x58] sm:$0xff]  ;;  %v3082_v27 = vld [vmem:[%s4591_s1 + $0x80] sm:$0xff]  ;;  %v3083_v29 = vld [vmem:[%s4591_s1 + $0x88] sm:$0xff]  ;;  %vm2955_vm13 = vcmask 64512  }
  0x49   : > { %v3075_v30 = vld [vmem:[%s4591_s1 + $0x70] sm:$0xff]  ;;  %v3076_v32 = vld [vmem:[%s4591_s1 + $0x78] sm:$0xff]  ;;  %vm372_vm5 = vcmp.eq.s32.totalorder %v367_v44, %v370_v45  ;;  %vm371_vm6 = vcmp.eq.s32.totalorder %v366_v40, %v370_v45  ;;  %v1110_v40 = vld [vmem:[%s4593_s3] sm:$0xff]  ;;  %s4623_s13 = smov (!%p360_p5, %s3912_s13), 1 }
  0x4a   : > { %946 = vperm.xlu1 %3737, %v936_v3   ;;  %941 = vperm.xlu0 %3736, %v935_v4   ;;  %v3084_v31 = vld [vmem:[%s4591_s1 + $0x90] sm:$0xff]  ;;  %v3085_v33 = vld [vmem:[%s4591_s1 + $0x98] sm:$0xff]  ;;  %v1682_v44 = vld [vmem:[%s4594_s4 + $0x8] sm:$0xff] }
  0x4b   : > { %v1681_v45 = vld [vmem:[%s4594_s4] sm:$0xff]  ;;  %vm4156_vm11 = vmneg %vm391_vm1 }
  0x4e   : > { %956 = vperm.xlu0 %3736, %v938_v6   ;;  %951 = vperm.xlu1 %3737, %v937_v7  }
  0xb4   : > { %v389_v8 = vpop.permute.xlu0 %388  ;;  %v708_v9 = vpop.permute.xlu1 %707 }
  0xb5   : > { %v392_v10 = vsel %vm391_vm1, 0.0, %v389_v8  ;;  %v711_v18 = vsel %vm710_vm3, %v708_v9, 0.0 }
  0xb6   : > { %3415 = vmatprep.subr.msk.mxu0 %vm410_vm2, %v392_v10  ;;  %3675 = vmatprep.subr.msk.mxu1 %vm410_vm2, %v392_v10 }
  0xb7   : > { %3416 = vmatpush3.msk.msra.mxu0 %vm410_vm2, %v392_v10  ;;  %3676 = vmatpush3.msk.msra.mxu1 %vm410_vm2, %v392_v10 }
  0xb8   : > { %3421 = vmatmul.mubr.msk.f32.vlgmr.msra.gmra.mxu1 %vm382_vm0, %v3053_v11  ;;  %v380_v14 = vpop.permute.xlu0 %379  ;;  %3418 = vmatmul.mubr.msk.f32.vlgmr.msra.gmra.mxu0 %vm382_vm0, %v3051_v12  ;;  %v822_v15 = vpop.permute.xlu1 %821 }
  0xb9   : > { %v383_v17 = vsel %vm382_vm0, 0.0, %v380_v14  ;;  %3425 = vmatprep.mubr.msk.f32.mxu1 %vm382_vm0, %v384_v13  ;;  %3431 = vmatprep.subr.msk.mxu0 %vm410_vm2, %v377_v0  ;;  %v825_v21 = vsel %vm824_vm4, %v822_v15, 0.0 }
  0xba   : > { %3423 = vmatprep.subr.msk.mxu1 %vm410_vm2, %v383_v17  ;;  %3432 = vmatpush3.msk.msra.mxu0 %vm410_vm2, %v377_v0 }
  0xbb   : > { %3424 = vmatpush3.msk.msra.mxu1 %vm410_vm2, %v383_v17  ;;  %3433 = vmatprep.mubr.msk.f32.mxu0 %vm382_vm0, %v3064_v16 }
  0xbc   : > { %3426 = vmatmul.mubr.msk.f32.vlgmr.msra.gmra.mxu1 %vm382_vm0, %v385_v19  ;;  %3439 = vmatprep.subr.msk.mxu1 %vm410_vm2, %v711_v18 }
  0xbd   : > { %3440 = vmatpush3.msk.msra.mxu1 %vm410_vm2, %v711_v18  ;;  %3434 = vmatmul.mubr.msk.f32.vlgmr.msra.gmra.mxu0 %vm382_vm0, %v3065_v20 }
  0xbe   : > { %3428 = vmatprep.mubr.msk.f32.mxu1 %vm382_vm0, %v386_v22  ;;  %3447 = vmatprep.subr.msk.mxu0 %vm410_vm2, %v825_v21 }
  0xbf   : > { %3448 = vmatpush3.msk.msra.mxu0 %vm410_vm2, %v825_v21  ;;  %3436 = vmatprep.mubr.msk.f32.mxu0 %vm382_vm0, %v3066_v23 }
  0xc0   : > { %3429 = vmatmul.mubr.msk.f32.gmra.mxu1 %vm382_vm0, %v387_v24  ;;  %3455 = vmatprep.subr.msk.mxu1 %vm372_vm5, %v3841_v51 }
  0xc1   : > { %3437 = vmatmul.mubr.msk.f32.gmra.mxu0 %vm382_vm0, %v3067_v25  ;;  %3441 = vmatprep.mubr.msk.f32.mxu1 %vm382_vm0, %v3073_v26 }
  0xc2   : > { %3449 = vmatprep.mubr.msk.f32.mxu0 %vm382_vm0, %v3082_v27 }
  0xc4   : > { %3442 = vmatmul.mubr.msk.f32.vlgmr.msra.gmra.mxu1 %vm382_vm0, %v3074_v28 }
  0xc5   : > { %3450 = vmatmul.mubr.msk.f32.vlgmr.msra.gmra.mxu0 %vm382_vm0, %v3083_v29  ;;  %3444 = vmatprep.mubr.msk.f32.mxu1 %vm382_vm0, %v3075_v30  ;;  %v947_v61 = vpop.permute.xlu1 %946  ;;  %v942_v63 = vpop.permute.xlu0 %941 }
  0xc6   : > { %3452 = vmatprep.mubr.msk.f32.mxu0 %vm382_vm0, %v3084_v31  ;;  %3456 = vmatpush3.msk.msra.mxu1 %vm372_vm5, %v3841_v51 }
  0xc7   : > { %3457 = vmatprep.subr.msk.mxu1 %vm371_vm6, %v3841_v51 }
  0xc8   : > { %3445 = vmatmul.mubr.msk.f32.gmra.mxu1 %vm382_vm0, %v3076_v32 }
  0xc9   : > { %3453 = vmatmul.mubr.msk.f32.gmra.mxu0 %vm382_vm0, %v3085_v33  ;;  %3458 = vmatpush3.msk.msra.mxu1 %vm371_vm6, %v3841_v51  ;;  %v957_v15 = vpop.permute.xlu0 %956  ;;  %v952_v18 = vpop.permute.xlu1 %951 }
 0x178   : > { %v3422_v34 = vpop.f32.mrf.mxu1  ;;  %v3419_v35 = vpop.f32.mrf.mxu0 }
 0x17a   : > { %v490_v36 = vpop.f32.mrf.mxu1  ;;  %v480_v37 = vpop.f32.mrf.mxu0 }
 0x17c   : > { %v3427_v39 = vpop.f32.mrf.mxu1 }
 0x17d   : > { %v3435_v42 = vpop.f32.mrf.mxu0  ;;  %v586_v46 = vadd.f32 %v3427_v39, %v3419_v35 }
 0x17e   : > { %v580_v43 = vpop.f32.mrf.mxu1 }
 0x17f   : > { %v684_v47 = vpop.f32.mrf.mxu0  ;;  %v581_v49 = vadd.f32 %v580_v43, %v480_v37  ;;  %v704_v53 = vadd.f32 %v3435_v42, %v586_v46  ;;  %v3097_v37 = vld [vmem:[%s4593_s3 + $0x20] sm:$0xff]  ;;  %v1684_v42 = vld [vmem:[%s4594_s4 + $0x18] sm:$0xff]  ;;  %v1683_v43 = vld [vmem:[%s4594_s4 + $0x10] sm:$0xff] }
 0x180   : > { %v3430_v48 = vpop.f32.mrf.mxu1  ;;  %3473 = vmatprep.mubr.msk.f32.mxu0 %vm1135_vm9, %v3097_v37 }
 0x181   : > { %v3438_v50 = vpop.f32.mrf.mxu0  ;;  %v596_v54 = vadd.f32 %v3430_v48, %v3422_v34  ;;  %v703_v57 = vadd.f32 %v684_v47, %v581_v49  ;;  %v2357_v49 = vld [vmem:[#allocation4 + $0x18] sm:$0xff] }
 0x182   : > { %v590_v52 = vpop.f32.mrf.mxu1 }
 0x183   : > { %v694_v55 = vpop.f32.mrf.mxu0  ;;  %v591_v58 = vadd.f32 %v590_v52, %v490_v36  ;;  %v706_v0 = vadd.f32 %v3438_v50, %v596_v54  ;;  %v2378_v50 = vld [vmem:[#allocation4 + $0x38] sm:$0xff] }
 0x184   : > { %v3443_v56 = vpop.f32.mrf.mxu1 }
 0x185   : > { %v818_v59 = vadd.f32 %v3443_v56, %v704_v53  ;;  %v3451_v60 = vpop.f32.mrf.mxu0  ;;  %v705_v5 = vadd.f32 %v694_v55, %v591_v58  ;;  %v3098_v56 = vld [vmem:[%s4593_s3 + $0x28] sm:$0xff]  ;;  %v3099_v58 = vld [vmem:[%s4593_s3 + $0x30] sm:$0xff] }
 0x186   : > { %v798_v62 = vpop.f32.mrf.mxu1 }
 0x187   : > { %v817_v1 = vadd.f32 %v798_v62, %v703_v57  ;;  %v932_v2 = vadd.f32 %v3451_v60, %v818_v59  ;;  %v912_v3 = vpop.f32.mrf.mxu0  ;;  %v3100_v60 = vld [vmem:[%s4593_s3 + $0x38] sm:$0xff] }
 0x188   : > { %v3446_v4 = vpop.f32.mrf.mxu1 }
 0x189   : > { %v960_v6 = vadd.f32 %v947_v61, %v932_v2  ;;  %v820_v7 = vadd.f32 %v3446_v4, %v706_v0  ;;  %v931_v8 = vadd.f32 %v912_v3, %v817_v1  ;;  %v3454_v9 = vpop.f32.mrf.mxu0  ;;  %v1111_v61 = vld [vmem:[%s4593_s3 + $0x8] sm:$0xff]  ;;  %v1112_v0 = vld [vmem:[%s4593_s3 + $0x10] sm:$0xff]  ;;  %v3125_v1 = vld [vmem:[%s4593_s3 + $0x40] sm:$0xff] }
 0x18a   : > { %v808_v10 = vpop.f32.mrf.mxu1  ;;  %v1113_v2 = vld [vmem:[%s4593_s3 + $0x18] sm:$0xff]  ;;  %v3126_v3 = vld [vmem:[%s4593_s3 + $0x48] sm:$0xff] }
 0x18b   : > { %v959_v11 = vadd.f32 %v942_v63, %v931_v8  ;;  %v819_v12 = vadd.f32 %v808_v10, %v705_v5  ;;  %v934_v13 = vadd.f32 %v3454_v9, %v820_v7  ;;  %969 = vrot.lane.b32.xlu0 %v960_v6, %s3842_s18  ;;  %v922_v14 = vpop.f32.mrf.mxu0  ;;  %v3133_v7 = vld [vmem:[%s4593_s3 + $0x60] sm:$0xff]  ;;  %v3128_v8 = vld [vmem:[%s4593_s3 + $0x58] sm:$0xff]  ;;  %v3134_v9 = vld [vmem:[%s4593_s3 + $0x68] sm:$0xff] }
 0x18d   : > { %v933_v16 = vadd.f32 %v922_v14, %v819_v12  ;;  %v962_v17 = vadd.f32 %v957_v15, %v934_v13  ;;  %967 = vrot.lane.b32.xlu1 %v959_v11, %s3842_s18  ;;  %v3145_v12 = vld [vmem:[%s4593_s3 + $0x80] sm:$0xff]  ;;  %v3136_v14 = vld [vmem:[%s4593_s3 + $0x78] sm:$0xff]  ;;  %v3146_v15 = vld [vmem:[%s4593_s3 + $0x88] sm:$0xff] }
 0x18f   : > { %v961_v19 = vadd.f32 %v952_v18, %v933_v16  ;;  %973 = vrot.lane.b32.xlu0 %v962_v17, %s3842_s18  ;;  %v3147_v16 = vld [vmem:[%s4593_s3 + $0x90] sm:$0xff] }
 0x191   : > { %971 = vrot.lane.b32.xlu1 %v961_v19, %s3842_s18 }
 0x1fd   : > { %v970_v20 = vpop.permute.xlu0 %969 }
 0x1fe   : > { %v981_v21 = vsel %vm979_vm7, %v970_v20, 0.0 }
 0x1ff   : > { %v968_v22 = vpop.permute.xlu1 %967  ;;  %v985_v26 = vmax.f32 %v960_v6, %v981_v21  ;;  %v3127_v6 = vld [vmem:[%s4593_s3 + $0x50] sm:$0xff] }
 0x200   : > { %v980_v23 = vsel %vm979_vm7, %v968_v22, 0.0 }
 0x201   : > { %v984_v24 = vmax.f32 %v959_v11, %v980_v23  ;;  %v974_v25 = vpop.permute.xlu0 %973  ;;  %v3135_v11 = vld [vmem:[%s4593_s3 + $0x70] sm:$0xff] }
 0x202   : > { %v983_v27 = vsel %vm979_vm7, %v974_v25, 0.0 }
 0x203   : > { %3459 = vmatprep.mubr.msk.f32.mxu1 %vm988_vm8, %v984_v24  ;;  %v972_v28 = vpop.permute.xlu1 %971  ;;  %v987_v31 = vmax.f32 %v962_v17, %v983_v27  ;;  %v3148_v17 = vld [vmem:[%s4593_s3 + $0x98] sm:$0xff] }
 0x204   : > { %v982_v29 = vsel %vm979_vm7, %v972_v28, 0.0  ;;  %3460 = vmatmul.mubr.msk.f32.vlgmr.msra.gmra.mxu1 %vm988_vm8, %v985_v26 }
 0x205   : > { %v986_v30 = vmax.f32 %v961_v19, %v982_v29 }
 0x207   : > { %3462 = vmatprep.mubr.msk.f32.mxu1 %vm988_vm8, %v986_v30 }
 0x208   : > { %3463 = vmatmul.mubr.msk.f32.gmra.mxu1 %vm988_vm8, %v987_v31 }
 0x209   : > { %3487 = vmatprep.mubr.msk.f32.mxu1 %vm1135_vm9, %v1110_v40 }
 0x2c4   : > { %v3461_v32 = vpop.f32.mrf.mxu1 }
 0x2c5   : > { %v4102_v33 = vmax.f32 %v3461_v32, 0.0 }
 0x2c6   : > { %v1067_v34 = vpop.f32.mrf.mxu1 }
 0x2c7   : > { %v4104_v35 = vmax.f32 %v1067_v34, 0.0  ;;  %1116 = vrot.lane.b32.xlu1 %v4102_v33, %s3836_s17 }
 0x2c8   : > { %v3464_v36 = vpop.f32.mrf.mxu1 }
 0x2c9   : > { %1094 = vrot.lane.b32.xlu0 %v4104_v35, %s3838_s25  ;;  %v1089_v38 = vmax.f32 %v3464_v36, 0.0 }
 0x2ca   : > { %v1077_v39 = vpop.f32.mrf.mxu1 }
 0x2cb   : > { %1114 = vrot.lane.b32.xlu1 %v4104_v35, %s3836_s17  ;;  %v1088_v41 = vmax.f32 %v1077_v39, 0.0 }
 0x2cd   : > { %1100 = vrot.lane.b32.xlu0 %v1089_v38, %s3838_s25 }
 0x2cf   : > { %1120 = vrot.lane.b32.xlu1 %v1089_v38, %s3836_s17 }
 0x2d1   : > { %1118 = vrot.lane.b32.xlu0 %v1088_v41, %s3836_s17 }
 0x2d3   : > { %1096 = vrot.lane.b32.xlu1 %v4102_v33, %s3838_s25 }
 0x2d5   : > { %1098 = vrot.lane.b32.xlu0 %v1088_v41, %s3838_s25 }
 0x2d7   : > { %1442 = vrot.lane.b32.xlu1 %v1089_v38, %s3837_s21 }
 0x2d9   : > { %1438 = vrot.lane.b32.xlu0 %v4102_v33, %s3837_s21 }
 0x2db   : > { %1565 = vrot.lane.b32.xlu1 %v1089_v38, %s3839_s26 }
 0x2dd   : > { %1440 = vrot.lane.b32.xlu0 %v1088_v41, %s3837_s21 }
 0x2df   : > { %1563 = vrot.lane.b32.xlu1 %v1088_v41, %s3839_s26 }
 0x2e1   : > { %1436 = vrot.lane.b32.xlu0 %v4104_v35, %s3837_s21 }
 0x2e3   : > { %1561 = vrot.lane.b32.xlu1 %v4102_v33, %s3839_s26 }
 0x2e5   : > { %1559 = vrot.lane.b32.xlu0 %v4104_v35, %s3839_s26 }
 0x2e7   : > { %1702 = vperm.xlu1 %3737, %v1684_v42  }
 0x2e9   : > { %1697 = vperm.xlu0 %3736, %v1683_v43  }
 0x2eb   : > { %1692 = vperm.xlu1 %3737, %v1682_v44  }
 0x2ed   : > { %1687 = vperm.xlu0 %3736, %v1681_v45  }
 0x339   : > { %v1117_v46 = vpop.permute.xlu1 %1116 }
 0x33b   : > { %v1095_v47 = vpop.permute.xlu0 %1094 }
 0x33d   : > { %v1115_v48 = vpop.permute.xlu1 %1114 }
 0x33f   : > { %v1101_v51 = vpop.permute.xlu0 %1100 }
 0x340   : > { %3479 = vmatprep.subr.msk.mxu1 %vm4151_vm10, %v1101_v51 }
 0x341   : > { %v1121_v52 = vpop.permute.xlu1 %1120  ;;  %3480 = vmatpush3.msk.msra.mxu1 %vm4151_vm10, %v1101_v51 }
 0x342   : > { %3465 = vmatprep.subr.msk.mxu0 %vm4156_vm11, %v1121_v52 }
 0x343   : > { %3466 = vmatpush3.msk.msra.mxu0 %vm4156_vm11, %v1121_v52  ;;  %v1119_v53 = vpop.permute.xlu0 %1118 }
 0x344   : > { %3467 = vmatprep.subr.msk.mxu0 %vm4156_vm11, %v1119_v53 }
 0x345   : > { %v1097_v54 = vpop.permute.xlu1 %1096  ;;  %3468 = vmatpush3.msk.msra.mxu0 %vm4156_vm11, %v1119_v53 }
 0x346   : > { %3469 = vmatprep.subr.msk.mxu0 %vm4156_vm11, %v1117_v46 }
 0x347   : > { %3470 = vmatpush3.msk.msra.mxu0 %vm4156_vm11, %v1117_v46  ;;  %v1099_v55 = vpop.permute.xlu0 %1098 }
 0x348   : > { %3471 = vmatprep.subr.msk.mxu0 %vm4156_vm11, %v1115_v48  ;;  %3481 = vmatprep.subr.msk.mxu1 %vm4151_vm10, %v1099_v55 }
 0x349   : > { %v1443_v57 = vpop.permute.xlu1 %1442  ;;  %3472 = vmatpush3.msk.msra.mxu0 %vm4156_vm11, %v1115_v48  ;;  %3482 = vmatpush3.msk.msra.mxu1 %vm4151_vm10, %v1099_v55 }
 0x34a   : > { %3474 = vmatmul.mubr.msk.f32.vlgmr.msra.gmra.mxu0 %vm1135_vm9, %v3098_v56  ;;  %3483 = vmatprep.subr.msk.mxu1 %vm4151_vm10, %v1097_v54 }
 0x34b   : > { %3493 = vmatprep.subr.mxu0 %v1089_v38  ;;  %3484 = vmatpush3.msk.msra.mxu1 %vm4151_vm10, %v1097_v54  ;;  %v1439_v59 = vpop.permute.xlu0 %1438 }
 0x34c   : > { %3494 = vmatpush3.msra.mxu0 %v1089_v38  ;;  %3485 = vmatprep.subr.msk.mxu1 %vm4151_vm10, %v1095_v47 }
 0x34d   : > { %3495 = vmatprep.subr.mxu0 %v1088_v41  ;;  %v1566_v62 = vpop.permute.xlu1 %1565  ;;  %3476 = vmatprep.mubr.msk.f32.mxu0 %vm1135_vm9, %v3099_v58 }
 0x34e   : > { %3486 = vmatpush3.msk.msra.mxu1 %vm4151_vm10, %v1095_v47  ;;  %3496 = vmatpush3.msra.mxu0 %v1088_v41 }
 0x34f   : > { %3477 = vmatmul.mubr.msk.f32.gmra.mxu0 %vm1135_vm9, %v3100_v60  ;;  %3488 = vmatmul.mubr.msk.f32.vlgmr.msra.gmra.mxu1 %vm1135_vm9, %v1111_v61  ;;  %v1441_v63 = vpop.permute.xlu0 %1440 }
 0x350   : > { %3497 = vmatprep.subr.mxu0 %v4102_v33  ;;  %3507 = vmatprep.subr.msk.mxu1 %vm1448_vm12, %v1443_v57 }
 0x351   : > { %3498 = vmatpush3.msra.mxu0 %v4102_v33  ;;  %3508 = vmatpush3.msk.msra.mxu1 %vm1448_vm12, %v1443_v57  ;;  %v1564_v4 = vpop.permute.xlu1 %1563 }
 0x352   : > { %3499 = vmatprep.subr.mxu0 %v4104_v35  ;;  %3509 = vmatprep.subr.msk.mxu1 %vm1448_vm12, %v1441_v63 }
 0x353   : > { %3490 = vmatprep.mubr.msk.f32.mxu1 %vm1135_vm9, %v1112_v0  ;;  %3500 = vmatpush3.msra.mxu0 %v4104_v35  ;;  %v1437_v5 = vpop.permute.xlu0 %1436 }
 0x354   : > { %3501 = vmatprep.mubr.msk.f32.mxu0 %vm1135_vm9, %v3125_v1  ;;  %3510 = vmatpush3.msk.msra.mxu1 %vm1448_vm12, %v1441_v63  ;;  %v3157_v1 = vld [vmem:[%s4595_s5 + $0x20] sm:$0xff] }
 0x355   : > { %3491 = vmatmul.mubr.msk.f32.gmra.mxu1 %vm1135_vm9, %v1113_v2  ;;  %3502 = vmatmul.mubr.msk.f32.vlgmr.msra.gmra.mxu0 %vm1135_vm9, %v3126_v3  ;;  %v1562_v10 = vpop.permute.xlu1 %1561 }
 0x356   : > { %3511 = vmatprep.subr.msk.mxu1 %vm1448_vm12, %v1439_v59  ;;  %3521 = vmatprep.subr.msk.mxu0 %vm382_vm0, %v1566_v62 }
 0x357   : > { %3512 = vmatpush3.msk.msra.mxu1 %vm1448_vm12, %v1439_v59  ;;  %3522 = vmatpush3.msk.msra.mxu0 %vm382_vm0, %v1566_v62  ;;  %v1560_v13 = vpop.permute.xlu0 %1559 }
 0x358   : > { %3513 = vmatprep.subr.msk.mxu1 %vm1448_vm12, %v1437_v5  ;;  %3523 = vmatprep.subr.msk.mxu0 %vm382_vm0, %v1564_v4 }
 0x359   : > { %3504 = vmatprep.mubr.msk.f32.mxu0 %vm1135_vm9, %v3127_v6  ;;  %3514 = vmatpush3.msk.msra.mxu1 %vm1448_vm12, %v1437_v5  ;;  %v2305_v6 = vld [vmem:[%s4596_s6 + $0x18] sm:$0xff] }
 0x35a   : > { %3515 = vmatprep.mubr.msk.f32.mxu1 %vm1135_vm9, %v3133_v7  ;;  %3524 = vmatpush3.msk.msra.mxu0 %vm382_vm0, %v1564_v4  ;;  %v1733_v4 = vld [vmem:[%s4595_s5] sm:$0xff]  ;;  %v2304_v7 = vld [vmem:[%s4596_s6 + $0x10] sm:$0xff] }
 0x35b   : > { %3505 = vmatmul.mubr.msk.f32.gmra.mxu0 %vm1135_vm9, %v3128_v8  ;;  %3516 = vmatmul.mubr.msk.f32.vlgmr.msra.gmra.mxu1 %vm1135_vm9, %v3134_v9  ;;  %v2303_v8 = vld [vmem:[%s4596_s6 + $0x8] sm:$0xff]  ;;  %v2302_v9 = vld [vmem:[%s4596_s6] sm:$0xff] }
 0x35c   : > { %3525 = vmatprep.subr.msk.mxu0 %vm382_vm0, %v1562_v10  ;;  %3518 = vmatprep.mubr.msk.f32.mxu1 %vm1135_vm9, %v3135_v11 }
 0x35d   : > { %3526 = vmatpush3.msk.msra.mxu0 %vm382_vm0, %v1562_v10  ;;  %3529 = vmatprep.mubr.msk.f32.mxu0 %vm1135_vm9, %v3145_v12 }
 0x35e   : > { %3527 = vmatprep.subr.msk.mxu0 %vm382_vm0, %v1560_v13 }
 0x35f   : > { %3528 = vmatpush3.msk.msra.mxu0 %vm382_vm0, %v1560_v13  ;;  %3519 = vmatmul.mubr.msk.f32.gmra.mxu1 %vm1135_vm9, %v3136_v14 }
 0x360   : > { %3530 = vmatmul.mubr.msk.f32.vlgmr.msra.gmra.mxu0 %vm1135_vm9, %v3146_v15  ;;  %3543 = vmatprep.mubr.msk.f32.mxu1 %vm1135_vm9, %v3157_v1 }
 0x361   : > { %3532 = vmatprep.mubr.msk.f32.mxu0 %vm1135_vm9, %v3147_v16 }
 0x362   : > { %v1703_v28 = vpop.permute.xlu1 %1702 }
 0x364   : > { %3533 = vmatmul.mubr.msk.f32.gmra.mxu0 %vm1135_vm9, %v3148_v17  ;;  %v1698_v36 = vpop.permute.xlu0 %1697 }
 0x365   : > { %3557 = vmatprep.mubr.msk.f32.mxu0 %vm1135_vm9, %v1733_v4 }
 0x366   : > { %v1693_v42 = vpop.permute.xlu1 %1692 }
 0x368   : > { %v1688_v55 = vpop.permute.xlu0 %1687 }
 0x40a   : > { %v3475_v18 = vpop.f32.mrf.mxu0 }
 0x40c   : > { %v1214_v19 = vpop.f32.mrf.mxu0 }
 0x40f   : > { %v3478_v20 = vpop.f32.mrf.mxu0  ;;  %v3489_v21 = vpop.f32.mrf.mxu1 }
 0x410   : > { %v1317_v29 = vadd.f32 %v3489_v21, %v3475_v18  ;;  %v3158_v18 = vld [vmem:[%s4595_s5 + $0x28] sm:$0xff] }
 0x411   : > { %v1224_v22 = vpop.f32.mrf.mxu0  ;;  %v1311_v23 = vpop.f32.mrf.mxu1 }
 0x412   : > { %v1312_v32 = vadd.f32 %v1311_v23, %v1214_v19  ;;  %v1734_v23 = vld [vmem:[%s4595_s5 + $0x8] sm:$0xff] }
 0x415   : > { %v3492_v24 = vpop.f32.mrf.mxu1  ;;  %v3503_v25 = vpop.f32.mrf.mxu0 }
 0x416   : > { %v1433_v33 = vadd.f32 %v3503_v25, %v1317_v29  ;;  %v1327_v37 = vadd.f32 %v3492_v24, %v3478_v20  ;;  %v3159_v20 = vld [vmem:[%s4595_s5 + $0x30] sm:$0xff]  ;;  %v3186_v29 = vld [vmem:[%s4595_s5 + $0x48] sm:$0xff] }
 0x417   : > { %v1321_v26 = vpop.f32.mrf.mxu1  ;;  %v1413_v27 = vpop.f32.mrf.mxu0 }
 0x418   : > { %v1432_v38 = vadd.f32 %v1413_v27, %v1312_v32  ;;  %v1322_v43 = vadd.f32 %v1321_v26, %v1224_v22  ;;  %v3160_v22 = vld [vmem:[%s4595_s5 + $0x38] sm:$0xff]  ;;  %v1735_v26 = vld [vmem:[%s4595_s5 + $0x10] sm:$0xff]  ;;  %v3185_v27 = vld [vmem:[%s4595_s5 + $0x40] sm:$0xff] }
 0x419   : > { %v3187_v32 = vld [vmem:[%s4595_s5 + $0x50] sm:$0xff] }
 0x41b   : > { %v3506_v30 = vpop.f32.mrf.mxu0  ;;  %v3517_v31 = vpop.f32.mrf.mxu1 }
 0x41c   : > { %v1556_v39 = vadd.f32 %v3517_v31, %v1433_v33  ;;  %v1435_v44 = vadd.f32 %v3506_v30, %v1327_v37  ;;  %v3193_v33 = vld [vmem:[%s4595_s5 + $0x60] sm:$0xff]  ;;  %v3195_v37 = vld [vmem:[%s4595_s5 + $0x70] sm:$0xff] }
 0x41d   : > { %v1423_v34 = vpop.f32.mrf.mxu0  ;;  %v1536_v35 = vpop.f32.mrf.mxu1 }
 0x41e   : > { %v1555_v45 = vadd.f32 %v1536_v35, %v1432_v38  ;;  %v1434_v51 = vadd.f32 %v1423_v34, %v1322_v43  ;;  %v3188_v34 = vld [vmem:[%s4595_s5 + $0x58] sm:$0xff]  ;;  %v3194_v35 = vld [vmem:[%s4595_s5 + $0x68] sm:$0xff]  ;;  %v3205_v38 = vld [vmem:[%s4595_s5 + $0x80] sm:$0xff] }
 0x41f   : > { %v3520_v40 = vpop.f32.mrf.mxu1  ;;  %v3208_v43 = vld [vmem:[%s4595_s5 + $0x98] sm:$0xff] }
 0x420   : > { %v3531_v41 = vpop.f32.mrf.mxu0  ;;  %v1558_v52 = vadd.f32 %v3520_v40, %v1435_v44  ;;  %v3196_v40 = vld [vmem:[%s4595_s5 + $0x78] sm:$0xff] }
 0x421   : > { %v1678_v46 = vadd.f32 %v3531_v41, %v1556_v39  ;;  %v1546_v47 = vpop.f32.mrf.mxu1  ;;  %v3206_v41 = vld [vmem:[%s4595_s5 + $0x88] sm:$0xff] }
 0x422   : > { %v1658_v48 = vpop.f32.mrf.mxu0  ;;  %v1557_v58 = vadd.f32 %v1546_v47, %v1434_v51 }
 0x423   : > { %v1706_v53 = vadd.f32 %v1693_v42, %v1678_v46  ;;  %v1677_v54 = vadd.f32 %v1658_v48, %v1555_v45  ;;  %v3207_v42 = vld [vmem:[%s4595_s5 + $0x90] sm:$0xff] }
 0x424   : > { %v3534_v56 = vpop.f32.mrf.mxu0 }
 0x425   : > { %v4284_v57 = vmax.f32 %v1706_v53, 0.0  ;;  %v1705_v59 = vadd.f32 %v1688_v55, %v1677_v54  ;;  %v1680_v60 = vadd.f32 %v3534_v56, %v1558_v52 }
 0x426   : > { %v1668_v61 = vpop.f32.mrf.mxu0 }
 0x427   : > { %v4286_v62 = vmax.f32 %v1705_v59, 0.0  ;;  %v1708_v63 = vadd.f32 %v1703_v28, %v1680_v60  ;;  %v1679_v0 = vadd.f32 %v1668_v61, %v1557_v58  ;;  %1739 = vrot.lane.b32.xlu1 %v4284_v57, %s3836_s17  ;;  %v1736_v28 = vld [vmem:[%s4595_s5 + $0x18] sm:$0xff] }
 0x429   : > { %1717 = vrot.lane.b32.xlu0 %v4286_v62, %s3838_s25  ;;  %v1712_v2 = vmax.f32 %v1708_v63, 0.0  ;;  %v1707_v3 = vadd.f32 %v1698_v36, %v1679_v0 }
 0x42b   : > { %1737 = vrot.lane.b32.xlu1 %v4286_v62, %s3836_s17  ;;  %v1711_v5 = vmax.f32 %v1707_v3, 0.0 }
 0x42d   : > { %1723 = vrot.lane.b32.xlu0 %v1712_v2, %s3838_s25 }
 0x42f   : > { %1743 = vrot.lane.b32.xlu1 %v1712_v2, %s3836_s17 }
 0x431   : > { %1741 = vrot.lane.b32.xlu0 %v1711_v5, %s3836_s17 }
 0x433   : > { %1719 = vrot.lane.b32.xlu1 %v4284_v57, %s3838_s25 }
 0x435   : > { %1721 = vrot.lane.b32.xlu0 %v1711_v5, %s3838_s25 }
 0x437   : > { %2064 = vrot.lane.b32.xlu1 %v1712_v2, %s3837_s21 }
 0x439   : > { %2060 = vrot.lane.b32.xlu0 %v4284_v57, %s3837_s21 }
 0x43b   : > { %2186 = vrot.lane.b32.xlu1 %v1712_v2, %s3839_s26 }
 0x43d   : > { %2062 = vrot.lane.b32.xlu0 %v1711_v5, %s3837_s21 }
 0x43f   : > { %2184 = vrot.lane.b32.xlu1 %v1711_v5, %s3839_s26 }
 0x441   : > { %2058 = vrot.lane.b32.xlu0 %v4286_v62, %s3837_s21 }
 0x443   : > { %2182 = vrot.lane.b32.xlu1 %v4284_v57, %s3839_s26 }
 0x445   : > { %2180 = vrot.lane.b32.xlu0 %v4286_v62, %s3839_s26 }
 0x447   : > { %2323 = vperm.xlu1 %3737, %v2305_v6  }
 0x449   : > { %2318 = vperm.xlu0 %3736, %v2304_v7  }
 0x44b   : > { %2313 = vperm.xlu1 %3737, %v2303_v8  }
 0x44d   : > { %2308 = vperm.xlu0 %3736, %v2302_v9  }
 0x499   : > { %v1740_v10 = vpop.permute.xlu1 %1739 }
 0x49b   : > { %v1718_v11 = vpop.permute.xlu0 %1717 }
 0x49d   : > { %v1738_v12 = vpop.permute.xlu1 %1737 }
 0x49f   : > { %v1724_v13 = vpop.permute.xlu0 %1723 }
 0x4a0   : > { %3549 = vmatprep.subr.msk.mxu0 %vm4151_vm10, %v1724_v13 }
 0x4a1   : > { %3550 = vmatpush3.msk.msra.mxu0 %vm4151_vm10, %v1724_v13  ;;  %v1744_v14 = vpop.permute.xlu1 %1743 }
 0x4a2   : > { %3535 = vmatprep.subr.msk.mxu1 %vm4156_vm11, %v1744_v14 }
 0x4a3   : > { %v1742_v15 = vpop.permute.xlu0 %1741  ;;  %3536 = vmatpush3.msk.msra.mxu1 %vm4156_vm11, %v1744_v14 }
 0x4a4   : > { %3537 = vmatprep.subr.msk.mxu1 %vm4156_vm11, %v1742_v15 }
 0x4a5   : > { %3538 = vmatpush3.msk.msra.mxu1 %vm4156_vm11, %v1742_v15  ;;  %v1720_v16 = vpop.permute.xlu1 %1719 }
 0x4a6   : > { %3539 = vmatprep.subr.msk.mxu1 %vm4156_vm11, %v1740_v10 }
 0x4a7   : > { %v1722_v17 = vpop.permute.xlu0 %1721  ;;  %3540 = vmatpush3.msk.msra.mxu1 %vm4156_vm11, %v1740_v10 }
 0x4a8   : > { %3541 = vmatprep.subr.msk.mxu1 %vm4156_vm11, %v1738_v12  ;;  %3551 = vmatprep.subr.msk.mxu0 %vm4151_vm10, %v1722_v17 }
 0x4a9   : > { %3542 = vmatpush3.msk.msra.mxu1 %vm4156_vm11, %v1738_v12  ;;  %3552 = vmatpush3.msk.msra.mxu0 %vm4151_vm10, %v1722_v17  ;;  %v2065_v19 = vpop.permute.xlu1 %2064 }
 0x4aa   : > { %3544 = vmatmul.mubr.msk.f32.vlgmr.msra.gmra.mxu1 %vm1135_vm9, %v3158_v18  ;;  %3553 = vmatprep.subr.msk.mxu0 %vm4151_vm10, %v1720_v16 }
 0x4ab   : > { %3563 = vmatprep.subr.mxu1 %v1712_v2  ;;  %v2061_v21 = vpop.permute.xlu0 %2060  ;;  %3554 = vmatpush3.msk.msra.mxu0 %vm4151_vm10, %v1720_v16 }
 0x4ac   : > { %3564 = vmatpush3.msra.mxu1 %v1712_v2  ;;  %3555 = vmatprep.subr.msk.mxu0 %vm4151_vm10, %v1718_v11 }
 0x4ad   : > { %3565 = vmatprep.subr.mxu1 %v1711_v5  ;;  %3546 = vmatprep.mubr.msk.f32.mxu1 %vm1135_vm9, %v3159_v20  ;;  %v2187_v24 = vpop.permute.xlu1 %2186 }
 0x4ae   : > { %3556 = vmatpush3.msk.msra.mxu0 %vm4151_vm10, %v1718_v11  ;;  %3566 = vmatpush3.msra.mxu1 %v1711_v5 }
 0x4af   : > { %3547 = vmatmul.mubr.msk.f32.gmra.mxu1 %vm1135_vm9, %v3160_v22  ;;  %3558 = vmatmul.mubr.msk.f32.vlgmr.msra.gmra.mxu0 %vm1135_vm9, %v1734_v23  ;;  %v2063_v25 = vpop.permute.xlu0 %2062 }
 0x4b0   : > { %3567 = vmatprep.subr.mxu1 %v4284_v57  ;;  %3577 = vmatprep.subr.msk.mxu0 %vm1448_vm12, %v2065_v19 }
 0x4b1   : > { %3568 = vmatpush3.msra.mxu1 %v4284_v57  ;;  %3578 = vmatpush3.msk.msra.mxu0 %vm1448_vm12, %v2065_v19  ;;  %v2185_v30 = vpop.permute.xlu1 %2184 }
 0x4b2   : > { %3569 = vmatprep.subr.mxu1 %v4286_v62  ;;  %3579 = vmatprep.subr.msk.mxu0 %vm1448_vm12, %v2063_v25 }
 0x4b3   : > { %3560 = vmatprep.mubr.msk.f32.mxu0 %vm1135_vm9, %v1735_v26  ;;  %3570 = vmatpush3.msra.mxu1 %v4286_v62  ;;  %v2059_v31 = vpop.permute.xlu0 %2058 }
 0x4b4   : > { %3571 = vmatprep.mubr.msk.f32.mxu1 %vm1135_vm9, %v3185_v27  ;;  %3580 = vmatpush3.msk.msra.mxu0 %vm1448_vm12, %v2063_v25  ;;  %v2375_v27 = vld [vmem:[#allocation4 + $0x20] sm:$0xff] }
 0x4b5   : > { %3561 = vmatmul.mubr.msk.f32.gmra.mxu0 %vm1135_vm9, %v1736_v28  ;;  %3572 = vmatmul.mubr.msk.f32.vlgmr.msra.gmra.mxu1 %vm1135_vm9, %v3186_v29  ;;  %v2183_v36 = vpop.permute.xlu1 %2182 }
 0x4b6   : > { %3581 = vmatprep.subr.msk.mxu0 %vm1448_vm12, %v2061_v21  ;;  %3591 = vmatprep.subr.msk.mxu1 %vm382_vm0, %v2187_v24 }
 0x4b7   : > { %3582 = vmatpush3.msk.msra.mxu0 %vm1448_vm12, %v2061_v21  ;;  %3592 = vmatpush3.msk.msra.mxu1 %vm382_vm0, %v2187_v24  ;;  %v2181_v39 = vpop.permute.xlu0 %2180 }
 0x4b8   : > { %3583 = vmatprep.subr.msk.mxu0 %vm1448_vm12, %v2059_v31  ;;  %3593 = vmatprep.subr.msk.mxu1 %vm382_vm0, %v2185_v30 }
 0x4b9   : > { %3574 = vmatprep.mubr.msk.f32.mxu1 %vm1135_vm9, %v3187_v32  ;;  %3584 = vmatpush3.msk.msra.mxu0 %vm1448_vm12, %v2059_v31  ;;  %v2923_v32 = vld [vmem:[%s4598_s8] sm:$0xff] }
 0x4ba   : > { %3585 = vmatprep.mubr.msk.f32.mxu0 %vm1135_vm9, %v3193_v33  ;;  %3594 = vmatpush3.msk.msra.mxu1 %vm382_vm0, %v2185_v30  ;;  %v2354_v30 = vld [vmem:[#allocation4] sm:$0xff] }
 0x4bb   : > { %3575 = vmatmul.mubr.msk.f32.gmra.mxu1 %vm1135_vm9, %v3188_v34  ;;  %3586 = vmatmul.mubr.msk.f32.vlgmr.msra.gmra.mxu0 %vm1135_vm9, %v3194_v35  ;;  %v2924_v33 = vld [vmem:[%s4598_s8 + $0x8] sm:$0xff]  ;;  %v2925_v34 = vld [vmem:[%s4598_s8 + $0x10] sm:$0xff]  ;;  %v2926_v35 = vld [vmem:[%s4598_s8 + $0x18] sm:$0xff] }
 0x4bc   : > { %3595 = vmatprep.subr.msk.mxu1 %vm382_vm0, %v2183_v36  ;;  %3588 = vmatprep.mubr.msk.f32.mxu0 %vm1135_vm9, %v3195_v37 }
 0x4bd   : > { %3596 = vmatpush3.msk.msra.mxu1 %vm382_vm0, %v2183_v36  ;;  %3599 = vmatprep.mubr.msk.f32.mxu1 %vm1135_vm9, %v3205_v38 }
 0x4be   : > { %3597 = vmatprep.subr.msk.mxu1 %vm382_vm0, %v2181_v39 }
 0x4bf   : > { %3598 = vmatpush3.msk.msra.mxu1 %vm382_vm0, %v2181_v39  ;;  %3589 = vmatmul.mubr.msk.f32.gmra.mxu0 %vm1135_vm9, %v3196_v40 }
 0x4c0   : > { %3600 = vmatmul.mubr.msk.f32.vlgmr.msra.gmra.mxu1 %vm1135_vm9, %v3206_v41  ;;  %3613 = vmatprep.mubr.msk.f32.mxu0 %vm1135_vm9, %v2375_v27 }
 0x4c1   : > { %3602 = vmatprep.mubr.msk.f32.mxu1 %vm1135_vm9, %v3207_v42 }
 0x4c2   : > { %v2324_v56 = vpop.permute.xlu1 %2323 }
 0x4c4   : > { %3603 = vmatmul.mubr.msk.f32.gmra.mxu1 %vm1135_vm9, %v3208_v43  ;;  %v2319_v0 = vpop.permute.xlu0 %2318 }
 0x4c5   : > { %3627 = vmatprep.mubr.msk.f32.mxu1 %vm1135_vm9, %v2354_v30 }
 0x4c6   : > { %v2314_v6 = vpop.permute.xlu1 %2313 }
 0x4c8   : > { %v2309_v17 = vpop.permute.xlu0 %2308 }
 0x56a   : > { %v3545_v44 = vpop.f32.mrf.mxu1 }
 0x56c   : > { %v1836_v45 = vpop.f32.mrf.mxu1 }
 0x56f   : > { %v3548_v46 = vpop.f32.mrf.mxu1  ;;  %v3559_v47 = vpop.f32.mrf.mxu0 }
 0x570   : > { %v1939_v57 = vadd.f32 %v3559_v47, %v3545_v44  ;;  %v2376_v44 = vld [vmem:[#allocation4 + $0x28] sm:$0xff] }
 0x571   : > { %v1846_v48 = vpop.f32.mrf.mxu1  ;;  %v1933_v51 = vpop.f32.mrf.mxu0 }
 0x572   : > { %v1934_v60 = vadd.f32 %v1933_v51, %v1836_v45 }
 0x575   : > { %v3562_v52 = vpop.f32.mrf.mxu0  ;;  %v3573_v53 = vpop.f32.mrf.mxu1 }
 0x576   : > { %v2055_v61 = vadd.f32 %v3573_v53, %v1939_v57  ;;  %v1949_v1 = vadd.f32 %v3562_v52, %v3548_v46  ;;  %v2377_v46 = vld [vmem:[#allocation4 + $0x30] sm:$0xff] }
 0x577   : > { %v1943_v54 = vpop.f32.mrf.mxu0  ;;  %v2035_v55 = vpop.f32.mrf.mxu1  ;;  %v2356_v53 = vld [vmem:[#allocation4 + $0x10] sm:$0xff] }
 0x578   : > { %v2054_v2 = vadd.f32 %v2035_v55, %v1934_v60  ;;  %v1944_v7 = vadd.f32 %v1943_v54, %v1846_v48  ;;  %v2355_v48 = vld [vmem:[#allocation4 + $0x8] sm:$0xff]  ;;  %v2574_v54 = vld [vmem:[#allocation4 + $0x40] sm:$0xff]  ;;  %v2577_v60 = vld [vmem:[#allocation4 + $0x58] sm:$0xff] }
 0x579   : > { %v2575_v55 = vld [vmem:[#allocation4 + $0x48] sm:$0xff] }
 0x57b   : > { %v3576_v58 = vpop.f32.mrf.mxu1  ;;  %v3587_v59 = vpop.f32.mrf.mxu0 }
 0x57c   : > { %v2177_v3 = vadd.f32 %v3587_v59, %v2055_v61  ;;  %v2057_v8 = vadd.f32 %v3576_v58, %v1949_v1  ;;  %v2576_v58 = vld [vmem:[#allocation4 + $0x50] sm:$0xff]  ;;  %v2696_v59 = vld [vmem:[#allocation4 + $0x60] sm:$0xff]  ;;  %v2697_v61 = vld [vmem:[#allocation4 + $0x68] sm:$0xff] }
 0x57d   : > { %v2045_v62 = vpop.f32.mrf.mxu1  ;;  %v2157_v63 = vpop.f32.mrf.mxu0 }
 0x57e   : > { %v2176_v9 = vadd.f32 %v2157_v63, %v2054_v2  ;;  %v2056_v13 = vadd.f32 %v2045_v62, %v1944_v7  ;;  %v2698_v63 = vld [vmem:[#allocation4 + $0x70] sm:$0xff]  ;;  %v2699_v2 = vld [vmem:[#allocation4 + $0x78] sm:$0xff] }
 0x57f   : > { %v3590_v4 = vpop.f32.mrf.mxu0 }
 0x580   : > { %v3601_v5 = vpop.f32.mrf.mxu1  ;;  %v2179_v14 = vadd.f32 %v3590_v4, %v2057_v8  ;;  %v2820_v4 = vld [vmem:[#allocation4 + $0x90] sm:$0xff] }
 0x581   : > { %v2299_v10 = vadd.f32 %v3601_v5, %v2177_v3  ;;  %v2167_v11 = vpop.f32.mrf.mxu0  ;;  %v2819_v3 = vld [vmem:[#allocation4 + $0x88] sm:$0xff]  ;;  %v2821_v5 = vld [vmem:[#allocation4 + $0x98] sm:$0xff] }
 0x582   : > { %v2279_v12 = vpop.f32.mrf.mxu1  ;;  %v2178_v20 = vadd.f32 %v2167_v11, %v2056_v13 }
 0x583   : > { %v2327_v15 = vadd.f32 %v2314_v6, %v2299_v10  ;;  %v2298_v16 = vadd.f32 %v2279_v12, %v2176_v9 }
 0x584   : > { %v3604_v18 = vpop.f32.mrf.mxu1 }
 0x585   : > { %v4456_v19 = vmax.f32 %v2327_v15, 0.0  ;;  %v2326_v21 = vadd.f32 %v2309_v17, %v2298_v16  ;;  %v2301_v22 = vadd.f32 %v3604_v18, %v2179_v14 }
 0x586   : > { %v2289_v23 = vpop.f32.mrf.mxu1 }
 0x587   : > { %v4458_v24 = vmax.f32 %v2326_v21, 0.0  ;;  %v2329_v25 = vadd.f32 %v2324_v56, %v2301_v22  ;;  %v2300_v26 = vadd.f32 %v2289_v23, %v2178_v20  ;;  %2360 = vrot.lane.b32.xlu1 %v4456_v19, %s3836_s17 }
 0x589   : > { %2338 = vrot.lane.b32.xlu0 %v4458_v24, %s3838_s25  ;;  %v2333_v28 = vmax.f32 %v2329_v25, 0.0  ;;  %v2328_v29 = vadd.f32 %v2319_v0, %v2300_v26  ;;  %v2818_v0 = vld [vmem:[#allocation4 + $0x80] sm:$0xff] }
 0x58b   : > { %2358 = vrot.lane.b32.xlu1 %v4458_v24, %s3836_s17  ;;  %v2332_v31 = vmax.f32 %v2328_v29, 0.0 }
 0x58d   : > { %2344 = vrot.lane.b32.xlu0 %v2333_v28, %s3838_s25 }
 0x58f   : > { %2364 = vrot.lane.b32.xlu1 %v2333_v28, %s3836_s17 }
 0x591   : > { %2362 = vrot.lane.b32.xlu0 %v2332_v31, %s3836_s17 }
 0x593   : > { %2340 = vrot.lane.b32.xlu1 %v4456_v19, %s3838_s25 }
 0x595   : > { %2342 = vrot.lane.b32.xlu0 %v2332_v31, %s3838_s25 }
 0x597   : > { %2685 = vrot.lane.b32.xlu1 %v2333_v28, %s3837_s21 }
 0x599   : > { %2681 = vrot.lane.b32.xlu0 %v4456_v19, %s3837_s21 }
 0x59b   : > { %2807 = vrot.lane.b32.xlu1 %v2333_v28, %s3839_s26 }
 0x59d   : > { %2683 = vrot.lane.b32.xlu0 %v2332_v31, %s3837_s21 }
 0x59f   : > { %2805 = vrot.lane.b32.xlu1 %v2332_v31, %s3839_s26 }
 0x5a1   : > { %2679 = vrot.lane.b32.xlu0 %v4458_v24, %s3837_s21 }
 0x5a3   : > { %2803 = vrot.lane.b32.xlu1 %v4456_v19, %s3839_s26 }
 0x5a5   : > { %2801 = vrot.lane.b32.xlu0 %v4458_v24, %s3839_s26  ;;  %s3263_s26 = sshll.u32 %s4623_s13, 5 }
 0x5a6   : > { %s364_s18 = scalar_lea.vmem %s4599_s9, %s3263_s26 }
 0x5a7   : > { %2929 = vperm.xlu1 %3737, %v2923_v32  }
 0x5a9   : > { %2934 = vperm.xlu0 %3736, %v2924_v33  }
 0x5ab   : > { %2939 = vperm.xlu1 %3737, %v2925_v34  }
 0x5ad   : > { %2944 = vperm.xlu0 %3736, %v2926_v35  }
 0x5f9   : > { %v2361_v36 = vpop.permute.xlu1 %2360 }
 0x5fb   : > { %v2339_v37 = vpop.permute.xlu0 %2338 }
 0x5fd   : > { %v2359_v38 = vpop.permute.xlu1 %2358 }
 0x5ff   : > { %v2345_v39 = vpop.permute.xlu0 %2344 }
 0x600   : > { %3619 = vmatprep.subr.msk.mxu1 %vm4151_vm10, %v2345_v39 }
 0x601   : > { %3620 = vmatpush3.msk.msra.mxu1 %vm4151_vm10, %v2345_v39  ;;  %v2365_v40 = vpop.permute.xlu1 %2364 }
 0x602   : > { %3605 = vmatprep.subr.msk.mxu0 %vm4156_vm11, %v2365_v40 }
 0x603   : > { %v2363_v41 = vpop.permute.xlu0 %2362  ;;  %3606 = vmatpush3.msk.msra.mxu0 %vm4156_vm11, %v2365_v40 }
 0x604   : > { %3607 = vmatprep.subr.msk.mxu0 %vm4156_vm11, %v2363_v41 }
 0x605   : > { %3608 = vmatpush3.msk.msra.mxu0 %vm4156_vm11, %v2363_v41  ;;  %v2341_v42 = vpop.permute.xlu1 %2340 }
 0x606   : > { %3609 = vmatprep.subr.msk.mxu0 %vm4156_vm11, %v2361_v36 }
 0x607   : > { %v2343_v43 = vpop.permute.xlu0 %2342  ;;  %3610 = vmatpush3.msk.msra.mxu0 %vm4156_vm11, %v2361_v36 }
 0x608   : > { %3611 = vmatprep.subr.msk.mxu0 %vm4156_vm11, %v2359_v38  ;;  %3621 = vmatprep.subr.msk.mxu1 %vm4151_vm10, %v2343_v43 }
 0x609   : > { %3612 = vmatpush3.msk.msra.mxu0 %vm4156_vm11, %v2359_v38  ;;  %3622 = vmatpush3.msk.msra.mxu1 %vm4151_vm10, %v2343_v43  ;;  %v2686_v45 = vpop.permute.xlu1 %2685 }
 0x60a   : > { %3614 = vmatmul.mubr.msk.f32.vlgmr.msra.gmra.mxu0 %vm1135_vm9, %v2376_v44  ;;  %3623 = vmatprep.subr.msk.mxu1 %vm4151_vm10, %v2341_v42 }
 0x60b   : > { %3633 = vmatprep.subr.mxu0 %v2333_v28  ;;  %v2682_v47 = vpop.permute.xlu0 %2681  ;;  %3624 = vmatpush3.msk.msra.mxu1 %vm4151_vm10, %v2341_v42 }
 0x60c   : > { %3634 = vmatpush3.msra.mxu0 %v2333_v28  ;;  %3625 = vmatprep.subr.msk.mxu1 %vm4151_vm10, %v2339_v37 }
 0x60d   : > { %3635 = vmatprep.subr.mxu0 %v2332_v31  ;;  %3616 = vmatprep.mubr.msk.f32.mxu0 %vm1135_vm9, %v2377_v46  ;;  %v2808_v51 = vpop.permute.xlu1 %2807 }
 0x60e   : > { %3626 = vmatpush3.msk.msra.mxu1 %vm4151_vm10, %v2339_v37  ;;  %3636 = vmatpush3.msra.mxu0 %v2332_v31 }
 0x60f   : > { %3617 = vmatmul.mubr.msk.f32.gmra.mxu0 %vm1135_vm9, %v2378_v50  ;;  %3628 = vmatmul.mubr.msk.f32.vlgmr.msra.gmra.mxu1 %vm1135_vm9, %v2355_v48  ;;  %v2684_v52 = vpop.permute.xlu0 %2683 }
 0x610   : > { %3637 = vmatprep.subr.mxu0 %v4456_v19  ;;  %3647 = vmatprep.subr.msk.mxu1 %vm1448_vm12, %v2686_v45 }
 0x611   : > { %3638 = vmatpush3.msra.mxu0 %v4456_v19  ;;  %3648 = vmatpush3.msk.msra.mxu1 %vm1448_vm12, %v2686_v45  ;;  %v2806_v56 = vpop.permute.xlu1 %2805 }
 0x612   : > { %3639 = vmatprep.subr.mxu0 %v4458_v24  ;;  %3649 = vmatprep.subr.msk.mxu1 %vm1448_vm12, %v2684_v52 }
 0x613   : > { %3630 = vmatprep.mubr.msk.f32.mxu1 %vm1135_vm9, %v2356_v53  ;;  %3640 = vmatpush3.msra.mxu0 %v4458_v24  ;;  %v2680_v57 = vpop.permute.xlu0 %2679 }
 0x614   : > { %3641 = vmatprep.mubr.msk.f32.mxu0 %vm1135_vm9, %v2574_v54  ;;  %3650 = vmatpush3.msk.msra.mxu1 %vm1448_vm12, %v2684_v52 }
 0x615   : > { %3631 = vmatmul.mubr.msk.f32.gmra.mxu1 %vm1135_vm9, %v2357_v49  ;;  %3642 = vmatmul.mubr.msk.f32.vlgmr.msra.gmra.mxu0 %vm1135_vm9, %v2575_v55  ;;  %v2804_v62 = vpop.permute.xlu1 %2803 }
 0x616   : > { %3651 = vmatprep.subr.msk.mxu1 %vm1448_vm12, %v2682_v47  ;;  %3661 = vmatprep.subr.msk.mxu0 %vm382_vm0, %v2808_v51 }
 0x617   : > { %3652 = vmatpush3.msk.msra.mxu1 %vm1448_vm12, %v2682_v47  ;;  %3662 = vmatpush3.msk.msra.mxu0 %vm382_vm0, %v2808_v51  ;;  %v2802_v1 = vpop.permute.xlu0 %2801 }
 0x618   : > { %3653 = vmatprep.subr.msk.mxu1 %vm1448_vm12, %v2680_v57  ;;  %3663 = vmatprep.subr.msk.mxu0 %vm382_vm0, %v2806_v56 }
 0x619   : > { %3644 = vmatprep.mubr.msk.f32.mxu0 %vm1135_vm9, %v2576_v58  ;;  %3654 = vmatpush3.msk.msra.mxu1 %vm1448_vm12, %v2680_v57 }
 0x61a   : > { %3655 = vmatprep.mubr.msk.f32.mxu1 %vm1135_vm9, %v2696_v59  ;;  %3664 = vmatpush3.msk.msra.mxu0 %vm382_vm0, %v2806_v56 }
 0x61b   : > { %3645 = vmatmul.mubr.msk.f32.gmra.mxu0 %vm1135_vm9, %v2577_v60  ;;  %3656 = vmatmul.mubr.msk.f32.vlgmr.msra.gmra.mxu1 %vm1135_vm9, %v2697_v61 }
 0x61c   : > { %3665 = vmatprep.subr.msk.mxu0 %vm382_vm0, %v2804_v62  ;;  %3658 = vmatprep.mubr.msk.f32.mxu1 %vm1135_vm9, %v2698_v63 }
 0x61d   : > { %3666 = vmatpush3.msk.msra.mxu0 %vm382_vm0, %v2804_v62  ;;  %3669 = vmatprep.mubr.msk.f32.mxu0 %vm1135_vm9, %v2818_v0 }
 0x61e   : > { %3667 = vmatprep.subr.msk.mxu0 %vm382_vm0, %v2802_v1 }
 0x61f   : > { %3668 = vmatpush3.msk.msra.mxu0 %vm382_vm0, %v2802_v1  ;;  %3659 = vmatmul.mubr.msk.f32.gmra.mxu1 %vm1135_vm9, %v2699_v2 }
 0x620   : > { %3670 = vmatmul.mubr.msk.f32.vlgmr.msra.gmra.mxu0 %vm1135_vm9, %v2819_v3 }
 0x621   : > { %3672 = vmatprep.mubr.msk.f32.mxu0 %vm1135_vm9, %v2820_v4 }
 0x622   : > { %v2930_v29 = vpop.permute.xlu1 %2929 }
 0x624   : > { %3673 = vmatmul.mubr.msk.f32.gmra.mxu0 %vm1135_vm9, %v2821_v5  ;;  %v2935_v27 = vpop.permute.xlu0 %2934 }
 0x626   : > { %v2940_v51 = vpop.permute.xlu1 %2939 }
 0x628   : > { %v2945_v45 = vpop.permute.xlu0 %2944 }
 0x6ca   : > { %v3615_v6 = vpop.f32.mrf.mxu0 }
 0x6cc   : > { %v2457_v7 = vpop.f32.mrf.mxu0 }
 0x6cf   : > { %v3618_v8 = vpop.f32.mrf.mxu0  ;;  %v3629_v9 = vpop.f32.mrf.mxu1 }
 0x6d0   : > { %v2560_v16 = vadd.f32 %v3629_v9, %v3615_v6 }
 0x6d1   : > { %v2467_v10 = vpop.f32.mrf.mxu0  ;;  %v2554_v11 = vpop.f32.mrf.mxu1 }
 0x6d2   : > { %v2555_v19 = vadd.f32 %v2554_v11, %v2457_v7 }
 0x6d5   : > { %v3632_v12 = vpop.f32.mrf.mxu1  ;;  %v3643_v13 = vpop.f32.mrf.mxu0 }
 0x6d6   : > { %v2676_v20 = vadd.f32 %v3643_v13, %v2560_v16  ;;  %v2570_v23 = vadd.f32 %v3632_v12, %v3618_v8 }
 0x6d7   : > { %v2564_v14 = vpop.f32.mrf.mxu1  ;;  %v2656_v15 = vpop.f32.mrf.mxu0 }
 0x6d8   : > { %v2675_v24 = vadd.f32 %v2656_v15, %v2555_v19  ;;  %v2565_v30 = vadd.f32 %v2564_v14, %v2467_v10 }
 0x6db   : > { %v3646_v17 = vpop.f32.mrf.mxu0  ;;  %v3657_v18 = vpop.f32.mrf.mxu1 }
 0x6dc   : > { %v2798_v25 = vadd.f32 %v3657_v18, %v2676_v20  ;;  %v2678_v31 = vadd.f32 %v3646_v17, %v2570_v23 }
 0x6dd   : > { %v2666_v21 = vpop.f32.mrf.mxu0  ;;  %v2778_v22 = vpop.f32.mrf.mxu1 }
 0x6de   : > { %v2797_v32 = vadd.f32 %v2778_v22, %v2675_v24  ;;  %v2677_v36 = vadd.f32 %v2666_v21, %v2565_v30 }
 0x6df   : > { %v3660_v26 = vpop.f32.mrf.mxu1 }
 0x6e0   : > { %v3671_v28 = vpop.f32.mrf.mxu0  ;;  %v2800_v37 = vadd.f32 %v3660_v26, %v2678_v31 }
 0x6e1   : > { %v2920_v33 = vadd.f32 %v3671_v28, %v2798_v25  ;;  %v2788_v34 = vpop.f32.mrf.mxu1 }
 0x6e2   : > { %v2900_v35 = vpop.f32.mrf.mxu0  ;;  %v2799_v42 = vadd.f32 %v2788_v34, %v2677_v36 }
 0x6e3   : > { %v2948_v38 = vadd.f32 %v2935_v27, %v2920_v33  ;;  %v2919_v39 = vadd.f32 %v2900_v35, %v2797_v32 }
 0x6e4   : > { %v3674_v40 = vpop.f32.mrf.mxu0 }
 0x6e5   : > { %v2952_v41 = vmax.f32 %v2948_v38, 0.0  ;;  %v2947_v43 = vadd.f32 %v2930_v29, %v2919_v39  ;;  %v2922_v44 = vadd.f32 %v3674_v40, %v2800_v37 }
 0x6e6   : > { %v2910_v46 = vpop.f32.mrf.mxu0 }
 0x6e7   : > { %2957 = vst.msk [vmem:[%s364_s18 + $0x8] sm:$0xff] %vm2955_vm13, %v2952_v41  ;;  %v2951_v47 = vmax.f32 %v2947_v43, 0.0  ;;  %v2950_v50 = vadd.f32 %v2945_v45, %v2922_v44  ;;  %v2921_v48 = vadd.f32 %v2910_v46, %v2799_v42 }
 0x6e9   : > { %2956 = vst.msk [vmem:[%s364_s18] sm:$0xff] %vm2955_vm13, %v2951_v47  ;;  %v2954_v52 = vmax.f32 %v2950_v50, 0.0  ;;  %v2949_v53 = vadd.f32 %v2940_v51, %v2921_v48 }
 0x6eb   : > { %2959 = vst.msk [vmem:[%s364_s18 + $0x18] sm:$0xff] %vm2955_vm13, %v2954_v52  ;;  %v2953_v54 = vmax.f32 %v2949_v53, 0.0 }
 0x6ed   : > { %2958 = vst.msk [vmem:[%s364_s18 + $0x10] sm:$0xff] %vm2955_vm13, %v2953_v54 }
 0x6ee PF: > { %s4618_s12 = sld [smem:[#allocation8_spill]]  ;;  %s4619_s30 = smov %s3822_s10 }
 0x6ef   : > { %s4620_s10 = smov %s3826_s11  ;;  %s4621_s11 = smov %s3954_s27 }
 0x6f4   : > { %p20_p7 = scmp.ge.s32.totalorder %s4618_s12, 4  }
 0x6f6   :  { %22 = sbr.rel (!%p20_p7) target bundleno = 4 (0x4), region = 116 }
 0x6fb   :  { %2981 = vsyncpa [#allocation3], 1 }
 0x6fc   :  { %2983 = vsyncpa [#allocation3 + $0x1], 1 }
 0x6fd   :  { %2984 = vsyncpa [#allocation5], 1 }

</bundles_post_ra>
